<compile_context>
chip_gen: v7x
topology: tpu7x:2x2x1
jax: 0.10.0
libtpu: 0.0.40
codegen_flags: <defaults>
</compile_context>

<pallas_src>
import functools
from collections import namedtuple

import jax
import jax.numpy as jnp
from jax import lax
from jax.experimental import pallas as pl
from jax.experimental.pallas import tpu as pltpu


_LANE = 128  # lane-padding multiple for the output-channel / contraction axes


def _round_up(x: int, m: int) -> int:
    return ((x + m - 1) // m) * m


def _vmem_block_bytes(shape, dtype) -> int:
    """Rough VMEM footprint of one block (sublane/lane padded)."""
    itemsize = jnp.dtype(dtype).itemsize
    sub_pack = 8 * (4 // itemsize)            # 8 f32 / 16 bf16 sublanes per tile
    lanes = _round_up(shape[-1], 128)
    subl = _round_up(shape[-2] if len(shape) > 1 else 1, sub_pack)
    lead = 1
    for d in shape[:-2]:
        lead *= int(d)
    return lead * subl * lanes * itemsize


def _vmem_limit_bytes(*block_bytes) -> int:
    """Shape-aware VMEM limit: double-buffered blocks + headroom, capped per-gen."""
    need = 2 * sum(block_bytes)               # double-buffered pipeline blocks
    limit = max(32 << 20, 4 * need)           # headroom for Mosaic scratch/spills
    cap = 48 << 20                            # safe default (v7x: 64 MiB physical)
    try:
        cap = int(pltpu.get_tpu_info().vmem_capacity_bytes * 3 // 4)
    except Exception:
        pass
    return int(min(limit, cap))


# ----------------------------------------------------------------------------
# Pallas kernel: fused 3x3 conv (tap-folded single MXU matmul) + bias + ReLU
# ----------------------------------------------------------------------------
def _conv3x3_bias_relu_kernel(x_ref, w_ref, b_ref, o_ref):
    # x_ref: (H+2, W+2, C)     bf16  spatially padded image, TRUE channel count
    # w_ref: (KCpad, Coutpad)  bf16  tap-folded flattened weight (resident)
    # b_ref: (1, Coutpad)      f32   bias row (resident)
    # o_ref: (H*W, Coutpad)    bf16  lane-dense output, written exactly once
    HP, WP, C = x_ref.shape
    H, W = HP - 2, WP - 2
    KC = w_ref.shape[0]

    # Hoist the W (sublane) shift out of the tap loop: 3 shifted slabs, each
    # collapsed to ((H+2)*W, C).  The per-tap slices below are on the leading
    # (non-tiled) axis and therefore cheap.
    slabs = [x_ref[:, dw:dw + W, :].reshape(HP * W, C) for dw in range(3)]

    # Fold all 9 taps into the contraction axis of ONE matmul: build the
    # (H*W, 9*C) patch locally and zero-pad to the weight's padded contraction
    # depth.  No o_ref read-modify-write anywhere.
    taps = [slabs[dw][dh * W:(dh + H) * W, :]
            for dh in range(3) for dw in range(3)]
    if KC > 9 * C:
        taps.append(jnp.zeros((H * W, KC - 9 * C), dtype=x_ref.dtype))
    patch = jnp.concatenate(taps, axis=-1)                       # (H*W, KCpad)

    # Single MXU matmul, f32 accumulation; f32 bias + ReLU epilogue (v5e-safe:
    # no bf16 elementwise math); single lane-dense bf16 store.
    acc = jnp.dot(patch, w_ref[...], preferred_element_type=jnp.float32)
    o_ref[...] = jnp.maximum(acc + b_ref[...], 0.0).astype(o_ref.dtype)


def _conv3x3_bias_relu_nhwc(x_nhwc, w2d, bias_row):
    """x: [N,H,W,C] f32; w2d: [KCpad,Coutpad] bf16; bias_row: [1,Coutpad] f32.

    Returns [N, H*W, Coutpad] bf16 (caller slices off the Cout padding).
    """
    N, H, W, C = x_nhwc.shape
    KCpad, Coutpad = w2d.shape

    # One fused XLA pass: SAME spatial halo + bf16 cast.  No channel padding in
    # HBM — the kernel reads the true C and pads the contraction in VMEM.
    xp = jnp.pad(x_nhwc.astype(jnp.bfloat16), ((0, 0), (1, 1), (1, 1), (0, 0)))

    vmem_limit = _vmem_limit_bytes(
        _vmem_block_bytes((H + 2, W + 2, C), jnp.bfloat16),   # input block
        _vmem_block_bytes((H * W, KCpad), jnp.bfloat16),      # in-kernel patch
        _vmem_block_bytes((H * W, Coutpad), jnp.float32),     # f32 accumulator
        _vmem_block_bytes((H * W, Coutpad), jnp.bfloat16),    # bf16 output blk
        _vmem_block_bytes((KCpad, Coutpad), jnp.bfloat16),    # resident weight
        _vmem_block_bytes((1, Coutpad), jnp.float32),         # resident bias
    )

    return pl.pallas_call(
        _conv3x3_bias_relu_kernel,
        out_shape=jax.ShapeDtypeStruct((N, H * W, Coutpad), jnp.bfloat16),
        grid=(N,),
        in_specs=[
            # one padded image per grid step (N dim squeezed away); last dims
            # equal the full array dims, so the true (unpadded) C is legal.
            pl.BlockSpec((None, H + 2, W + 2, C), lambda n: (n, 0, 0, 0)),
            # weight / bias: constant index map -> fetched once, stay resident.
            # TODO(synk): pipeline_mode=pl.Buffered(1) for these once
            # _LANE=256 makes the resident operands non-trivial in VMEM.
            pl.BlockSpec((KCpad, Coutpad), lambda n: (0, 0)),
            pl.BlockSpec((1, Coutpad), lambda n: (0, 0)),
        ],
        out_specs=pl.BlockSpec((None, H * W, Coutpad), lambda n: (n, 0, 0)),
        compiler_params=pltpu.CompilerParams(
            dimension_semantics=("parallel",),    # megacore-shardable on v7x
            vmem_limit_bytes=vmem_limit),
    )(xp, w2d, bias_row)


@functools.partial(jax.jit, static_argnames=("layout", "c_out"))
def _trt_engine_forward(x, w2d, bias_row, *, layout, c_out):
    if layout == "NCHW":                          # opt-in layout flip only
        x = jnp.transpose(x, (0, 2, 3, 1))
    N, H, W, _ = x.shape
    y = _conv3x3_bias_relu_nhwc(x, w2d, bias_row)     # [N, H*W, Coutpad] bf16
    # drop lane padding, restore the declared f32 output dtype
    y = y[:, :, :c_out].astype(jnp.float32).reshape(N, H, W, c_out)
    if layout == "NCHW":
        y = jnp.transpose(y, (0, 3, 1, 2))
    return y


# ----------------------------------------------------------------------------
# TRTModule-equivalent wrapper (binding bookkeeping + forward semantics)
# ----------------------------------------------------------------------------
Tensor = namedtuple("Tensor", ("name", "dtype", "shape"))


class TRTModulePallas:
    """Mirrors TRTModule's forward contract for a synthetic single-conv engine."""

    def __init__(self, in_shape=(2, 4, 16, 16), c_out=8, layout="NCHW"):
        assert layout in ("NCHW", "NHWC")
        self.layout = layout
        if layout == "NCHW":
            N, C, H, W = in_shape
            out_shape = (N, c_out, H, W)
        else:
            N, H, W, C = in_shape
            out_shape = (N, H, W, c_out)
        self.c_out = c_out

        # TRTModule binding bookkeeping (1 input / 1 output, static shapes)
        self.num_inputs = 1
        self.num_outputs = 1
        self.input_names = ["images"]
        self.output_names = ["output0"]
        self.idx = list(range(self.num_outputs))
        self.idynamic = False
        self.odynamic = False
        self.inp_info = [Tensor("images", jnp.float32, in_shape)]
        self.out_info = [Tensor("output0", jnp.float32, out_shape)]

        # deterministic synthetic "engine weights" (no checkpoint load)
        kcount = c_out * C * 3 * 3
        self.weight = (jnp.arange(kcount, dtype=jnp.float32)
                       .reshape(c_out, C, 3, 3) / kcount - 0.5) * 0.2
        self.bias = (jnp.arange(c_out, dtype=jnp.float32) / c_out - 0.5) * 0.1

        # Precompute the kernel-side weight layout once:
        #   [Cout, C, 3, 3] -> tap-folded [(dh,dw,c), Cout] -> zero-padded
        #   [KCpad, Coutpad] bf16.  Contraction index = (dh*3 + dw)*C + c,
        #   matching the kernel's patch construction order.
        kc = 9 * C
        kcpad = _round_up(kc, _LANE)
        copad = _round_up(c_out, _LANE)
        w_taps = jnp.transpose(self.weight, (2, 3, 1, 0)).reshape(kc, c_out)
        self._w2d = jnp.pad(
            w_taps, ((0, kcpad - kc), (0, copad - c_out))).astype(jnp.bfloat16)
        self._bias_row = jnp.pad(
            self.bias, (0, copad - c_out)).reshape(1, copad).astype(jnp.float32)

    def set_desired(self, desired):
        if isinstance(desired, (list, tuple)) and len(desired) == self.num_outputs:
            self.idx = [self.output_names.index(i) for i in desired]

    def __call__(self, *inputs):
        assert len(inputs) == self.num_inputs
        outputs = [_trt_engine_forward(inputs[0], self._w2d, self._bias_row,
                                       layout=self.layout, c_out=self.c_out)]
        return (tuple(outputs[i] for i in self.idx)
                if len(outputs) > 1 else outputs[0])


# ----------------------------------------------------------------------------
if __name__ == "__main__":
    key = jax.random.PRNGKey(0)
    x = jax.random.normal(key, (2, 4, 16, 16), dtype=jnp.float32)  # NCHW

    module = TRTModulePallas(in_shape=(2, 4, 16, 16), c_out=8, layout="NCHW")
    y = module(x)
    y = jax.block_until_ready(y)

    # Reference: pure-JAX conv on bf16-rounded operands (kernel feeds the MXU
    # bf16 operands, accumulates + applies bias/ReLU in f32, stores bf16).
    xb = x.astype(jnp.bfloat16).astype(jnp.float32)
    wb = module.weight.astype(jnp.bfloat16).astype(jnp.float32)
    y_ref = lax.conv_general_dilated(
        xb, wb, window_strides=(1, 1), padding="SAME",
        dimension_numbers=("NCHW", "OIHW", "NCHW"))
    y_ref = jnp.maximum(y_ref + module.bias[None, :, None, None], 0.0)

    assert y.shape == (2, 8, 16, 16)
    # tolerance covers the final bf16 store rounding
    assert jnp.allclose(y, y_ref, atol=2e-2, rtol=2e-2)

    print("KERNEL_OK")
</pallas_src>

<mosaic_0001>
module attributes {stable_mosaic.version = 11 : i64} {
  func.func @_conv3x3_bias_relu_kernel(%arg0: i32, %arg1: memref<1x18x18x4xbf16, #tpu.memory_space<vmem>>, %arg2: memref<128x128xbf16, #tpu.memory_space<vmem>>, %arg3: memref<1x128xf32, #tpu.memory_space<vmem>>, %arg4: memref<1x256x128xbf16, #tpu.memory_space<vmem>>) attributes {dimension_semantics = [#tpu.dimension_semantics<parallel>], iteration_bounds = array<i64: 2>, scalar_prefetch = 0 : i64, scratch_operands = 0 : i64, tpu.core_type = #tpu.core_type<tc>, window_params = [{transform_indices = @transform_0, window_bounds = array<i64: 1, 18, 18, 4>}, {pipeline_mode = #tpu.pipeline_mode<synchronous>, transform_indices = @transform_1, window_bounds = array<i64: 128, 128>}, {pipeline_mode = #tpu.pipeline_mode<synchronous>, transform_indices = @transform_2, window_bounds = array<i64: 1, 128>}, {transform_indices = @transform_3, window_bounds = array<i64: 1, 256, 128>}]} {
    %c0 = arith.constant 0 : index
    %c0_0 = arith.constant 0 : index
    %c0_1 = arith.constant 0 : index
    %c0_2 = arith.constant 0 : index
    %0 = vector.load %arg1[%c0, %c0_0, %c0_1, %c0_2] : memref<1x18x18x4xbf16, #tpu.memory_space<vmem>>, vector<1x18x16x4xbf16>
    %1 = vector.shape_cast %0 : vector<1x18x16x4xbf16> to vector<18x16x4xbf16>
    %2 = vector.shape_cast %1 : vector<18x16x4xbf16> to vector<288x4xbf16>
    %c0_3 = arith.constant 0 : index
    %c0_4 = arith.constant 0 : index
    %c1 = arith.constant 1 : index
    %c0_5 = arith.constant 0 : index
    %3 = vector.load %arg1[%c0_3, %c0_4, %c1, %c0_5] : memref<1x18x18x4xbf16, #tpu.memory_space<vmem>>, vector<1x18x16x4xbf16>
    %4 = vector.shape_cast %3 : vector<1x18x16x4xbf16> to vector<18x16x4xbf16>
    %5 = vector.shape_cast %4 : vector<18x16x4xbf16> to vector<288x4xbf16>
    %c0_6 = arith.constant 0 : index
    %c0_7 = arith.constant 0 : index
    %c2 = arith.constant 2 : index
    %c0_8 = arith.constant 0 : index
    %6 = vector.load %arg1[%c0_6, %c0_7, %c2, %c0_8] : memref<1x18x18x4xbf16, #tpu.memory_space<vmem>>, vector<1x18x16x4xbf16>
    %7 = vector.shape_cast %6 : vector<1x18x16x4xbf16> to vector<18x16x4xbf16>
    %8 = vector.shape_cast %7 : vector<18x16x4xbf16> to vector<288x4xbf16>
    %9 = vector.extract_strided_slice %2 {offsets = [0, 0], sizes = [256, 4], strides = [1, 1]} : vector<288x4xbf16> to vector<256x4xbf16>
    %10 = vector.extract_strided_slice %5 {offsets = [0, 0], sizes = [256, 4], strides = [1, 1]} : vector<288x4xbf16> to vector<256x4xbf16>
    %11 = vector.extract_strided_slice %8 {offsets = [0, 0], sizes = [256, 4], strides = [1, 1]} : vector<288x4xbf16> to vector<256x4xbf16>
    %12 = vector.extract_strided_slice %2 {offsets = [16, 0], sizes = [256, 4], strides = [1, 1]} : vector<288x4xbf16> to vector<256x4xbf16>
    %13 = vector.extract_strided_slice %5 {offsets = [16, 0], sizes = [256, 4], strides = [1, 1]} : vector<288x4xbf16> to vector<256x4xbf16>
    %14 = vector.extract_strided_slice %8 {offsets = [16, 0], sizes = [256, 4], strides = [1, 1]} : vector<288x4xbf16> to vector<256x4xbf16>
    %15 = vector.extract_strided_slice %2 {offsets = [32, 0], sizes = [256, 4], strides = [1, 1]} : vector<288x4xbf16> to vector<256x4xbf16>
    %16 = vector.extract_strided_slice %5 {offsets = [32, 0], sizes = [256, 4], strides = [1, 1]} : vector<288x4xbf16> to vector<256x4xbf16>
    %17 = vector.extract_strided_slice %8 {offsets = [32, 0], sizes = [256, 4], strides = [1, 1]} : vector<288x4xbf16> to vector<256x4xbf16>
    %cst = arith.constant 0.000000e+00 : bf16
    %18 = vector.broadcast %cst : bf16 to vector<256x92xbf16>
    %19 = tpu.concatenate %9, %10, %11, %12, %13, %14, %15, %16, %17, %18 in 1 : vector<256x4xbf16>, vector<256x4xbf16>, vector<256x4xbf16>, vector<256x4xbf16>, vector<256x4xbf16>, vector<256x4xbf16>, vector<256x4xbf16>, vector<256x4xbf16>, vector<256x4xbf16>, vector<256x92xbf16> -> vector<256x128xbf16>
    %c0_9 = arith.constant 0 : index
    %c0_10 = arith.constant 0 : index
    %20 = vector.load %arg2[%c0_9, %c0_10] : memref<128x128xbf16, #tpu.memory_space<vmem>>, vector<128x128xbf16>
    %cst_11 = arith.constant dense<0.000000e+00> : vector<256x128xf32>
    %21 = tpu.matmul %19, %20, %cst_11 {dimension_numbers = #tpu.dot_dimension_numbers<[1], [0], [0], [1], [0, 0, 1, 1], [], []>} : vector<256x128xbf16>, vector<128x128xbf16>, vector<256x128xf32> -> vector<256x128xf32>
    %c0_12 = arith.constant 0 : index
    %c0_13 = arith.constant 0 : index
    %22 = vector.load %arg3[%c0_12, %c0_13] : memref<1x128xf32, #tpu.memory_space<vmem>>, vector<1x128xf32>
    %23 = vector.broadcast %22 : vector<1x128xf32> to vector<256x128xf32>
    %24 = arith.addf %21, %23 : vector<256x128xf32>
    %cst_14 = arith.constant 0.000000e+00 : f32
    %25 = vector.broadcast %cst_14 : f32 to vector<256x128xf32>
    %26 = arith.maximumf %24, %25 : vector<256x128xf32>
    %27 = arith.truncf %26 : vector<256x128xf32> to vector<256x128xbf16>
    %c0_15 = arith.constant 0 : index
    %c0_16 = arith.constant 0 : index
    %c0_17 = arith.constant 0 : index
    %28 = vector.load %arg4[%c0_15, %c0_16, %c0_17] : memref<1x256x128xbf16, #tpu.memory_space<vmem>>, vector<1x256x128xbf16>
    %29 = vector.shape_cast %28 : vector<1x256x128xbf16> to vector<256x128xbf16>
    %30 = vector.shape_cast %27 : vector<256x128xbf16> to vector<1x256x128xbf16>
    tpu.vector_store %arg4[%c0_15, %c0_16, %c0_17], %30 {strides = array<i32>} : memref<1x256x128xbf16, #tpu.memory_space<vmem>>, vector<1x256x128xbf16>,
    return
  }
  func.func @transform_0(%arg0: i32) -> (i32, i32, i32, i32) {
    %c0_i32 = arith.constant 0 : i32
    %c0_i32_0 = arith.constant 0 : i32
    %c0_i32_1 = arith.constant 0 : i32
    %c0_i32_2 = arith.constant 0 : i32
    return %arg0, %c0_i32, %c0_i32_0, %c0_i32_1 : i32, i32, i32, i32
  }
  func.func @transform_1(%arg0: i32) -> (i32, i32) {
    %c0_i32 = arith.constant 0 : i32
    %c0_i32_0 = arith.constant 0 : i32
    %c0_i32_1 = arith.constant 0 : i32
    return %c0_i32, %c0_i32_0 : i32, i32
  }
  func.func @transform_2(%arg0: i32) -> (i32, i32) {
    %c0_i32 = arith.constant 0 : i32
    %c0_i32_0 = arith.constant 0 : i32
    %c0_i32_1 = arith.constant 0 : i32
    return %c0_i32, %c0_i32_0 : i32, i32
  }
  func.func @transform_3(%arg0: i32) -> (i32, i32, i32) {
    %c0_i32 = arith.constant 0 : i32
    %c0_i32_0 = arith.constant 0 : i32
    %c0_i32_1 = arith.constant 0 : i32
    return %arg0, %c0_i32, %c0_i32_0 : i32, i32, i32
  }
}

</mosaic_0001>

<bundles_post_ra>
// kernel: _trt_engine_forward.1
= control target key start
LH: loop header
LB: loop body
LE: loop exit
PB: predicated region body
PF: predicated region fallthrough
CT: control target
= control target key end

     0   :  { %s2526_s12 = smov 0   ;;  %s3669_s0 = inlined_call_operand.vmem [shape: bf16[2,18,18,4], index: 0, kind: input, shape index: {}]   ;;  %s3670_s1 = inlined_call_operand.vmem [shape: bf16[128,128], index: 1, kind: input, shape index: {}]   ;;  %s3671_s2 = inlined_call_operand.vmem [shape: f32[1,128], index: 2, kind: input, shape index: {}]   ;;  %s3672_s3 = inlined_call_operand.vmem [shape: bf16[2,256,128], index: 3, kind: output, shape index: {}]  }
   0x1 LB: > { %s2091_s13 = sadd.s32 4294967295, %s2496_s12   ;;  %p2095_p0 = scmp.ge.s32.totalorder %s2496_s12, 1  ;;  %s2496_s12 = sphi %s2526_s12, %s13_s12  }
   0x2   : > { %p137_p1 = scmp.lt.s32.totalorder %s2496_s12, 3 }
   0x4   : > { %p138_p2 = pnand %p2095_p0, %p137_p1 }
   0x6   : > { %141 = sbr.rel (%p138_p2) target bundleno = 625 (0x271), region = 32 }
   0xd   : > { %p161_p3 = scmp.lt.s32.totalorder %s2091_s13, 1  ;;  %vm733_vm0 = vcmask 1042432   ;;  %vm734_vm1 = vcmask 1046532   ;;  %vm226_vm2 = vsmask.f32 3328  ;;  %s2498_s18 = smov 12  }
   0xe   : > { %vm227_vm3 = vsmask.f32 7440  ;;  %vm2572_vm4 = vmor %vm733_vm0, %vm734_vm1  ;;  %s2499_s19 = smov 8   ;;  %s2500_s20 = smov 4   ;;  %vm1298_vm6 = vcmask 31744   ;;  %vm1347_vm7 = vcmask 64512  }
   0xf   : > { %s3700_s13 = smov (!%p161_p3, %s2091_s13), 1  ;;  %vm2606_vm5 = vmor %vm226_vm2, %vm227_vm3  ;;  %s2501_s21 = smov 16   ;;  %vm1380_vm8 = vcmask 97280   ;;  %vm1413_vm9 = vcmask 130048   ;;  %vm1446_vm10 = vcmask 162816   ;;  %vm1479_vm11 = vcmask 195584  }
  0x10   : > { %s2446_s14 = smul.u32 216, %s3700_s13  ;;  %s2502_s26 = smov 20   ;;  %vm1512_vm12 = vcmask 228352   ;;  %vm1545_vm13 = vcmask 261120   ;;  %vm1578_vm14 = vcmask 293888  }
  0x11   : > { %s2503_s4 = smov 24   ;;  %s2504_s9 = smov 28  }
  0x12   : > { %s2540_s17 = scalar_lea.vmem %s3669_s0, %s2446_s14  ;;  %s2505_s16 = smov 32  }
  0x13   : > { %v190_v0 = vld [vmem:[%s2540_s17 + $0x6c] sm:$0xf]  ;;  %v2544_v1 = vld [vmem:[%s2540_s17 + $0x70] sm:$0xf]  ;;  %v2555_v12 = vld [vmem:[%s2540_s17 + $0x64] sm:$0xf] }
  0x14   : > { %v174_v2 = vld [vmem:[%s2540_s17 + $0xc] sm:$0xf]  ;;  %v459_v3 = vshrl.u32 %v2544_v1, 16  ;;  %v2549_v4 = vcombine.low %v190_v0, %v2544_v1  ;;  %v446_v5 = vshrl.u32 %v190_v0, 16  ;;  %v449_v6 = vshll.u32 %v190_v0, 16 }
  0x15   : > { %v175_v7 = vld [vmem:[%s2540_s17 + $0x10] sm:$0xf]  ;;  %v254_v11 = vshrl.u32 %v174_v2, 16  ;;  %v257_v15 = vshll.u32 %v174_v2, 16  ;;  %v2564_v16 = vld [vmem:[%s2540_s17 + $0x68] sm:$0x1] }
  0x16   : > { %v263_v8 = vshll.u32 %v175_v7, 16  ;;  %v267_v9 = vshrl.u32 %v175_v7, 16  ;;  %v2552_v10 = vcombine.low %v174_v2, %v175_v7  ;;  %1106 = vrot.lane.b32.xlu1 %v2549_v4, %s2498_s18  ;;  %v2559_v13 = vrot.slane %v446_v5, 4  ;;  %v669_v20 = vld [vmem:[%s2540_s17 + $0x60] sm:$0xe] }
  0x17   : > { %v2561_v14 = vrot.slane %v449_v6, 5  ;;  %v794_v17 = vrot.slane %v2555_v12, 5  ;;  %v256_v19 = vrot.slane %v254_v11, 4  ;;  %v797_v22 = vrot.slane %v2564_v16, 5  ;;  %v2579_v27 = vld [vmem:[%s2540_s17 + $0x4] sm:$0xf] }
  0x18   : > { %v269_v18 = vrot.slane %v267_v9, 4  ;;  %1090 = vrot.lane.b32.xlu0 %v2552_v10, %s2498_s18  ;;  %v801_v23 = vrot.slane %v2544_v1, 5  ;;  %v259_v24 = vrot.slane %v257_v15, 5  ;;  %v2107_v25 = vrot.slane %v669_v20, 9  ;;  %v208_v29 = vld [vmem:[%s2540_s17 + $0x8] sm:$0x1] }
  0x19   : > { %v796_v26 = vrot.slane %v794_v17, 4  ;;  %v745_v28 = vrot.slane %v175_v7, 5  ;;  %v661_v30 = vld [vmem:[%s2540_s17] sm:$0xe]  ;;  %v738_v31 = vrot.slane %v2579_v27, 5  ;;  %v452_v33 = vor.u32 %v2561_v14, %v2559_v13 }
  0x1a   : > { %v803_v32 = vrot.slane %v801_v23, 4  ;;  %v260_v34 = vor.u32 %v259_v24, %v256_v19  ;;  %v795_v35 = vsel %vm2572_vm4, %v2107_v25, %v794_v17  ;;  %v2099_v37 = vrot.slane %v661_v30, 9  ;;  %v217_v38 = vld [vmem:[%s2540_s17 + $0x74] sm:$0x1]  ;;  %v670_v39 = vld [vmem:[%s2540_s17 + $0x6c] sm:$0xe] }
  0x1b   : > { %v798_v36 = vsel %vm2572_vm4, %v796_v26, %v797_v22  ;;  %v740_v41 = vrot.slane %v738_v31, 4  ;;  %v741_v42 = vrot.slane %v208_v29, 5  ;;  %v2108_v43 = vrot.slane %v670_v39, 9  ;;  %v209_v44 = vld [vmem:[%s2540_s17 + $0x14] sm:$0x1] }
  0x1c   : > { %v2592_v40 = vcombine.low %v795_v35, %v798_v36  ;;  %v261_v45 = vrot.slane %v260_v34, 4  ;;  %v739_v46 = vsel %vm2572_vm4, %v2099_v37, %v738_v31  ;;  %v804_v47 = vrot.slane %v217_v38, 5  ;;  %v662_v48 = vld [vmem:[%s2540_s17 + $0xc] sm:$0xe]  ;;  %v2611_v55 = vld [vmem:[%s2540_s17] sm:$0xf] }
  0x1d   : > { %v747_v49 = vrot.slane %v745_v28, 4  ;;  %v742_v50 = vsel %vm2572_vm4, %v740_v41, %v741_v42  ;;  %v802_v51 = vsel %vm2572_vm4, %v2108_v43, %v801_v23  ;;  %v2100_v52 = vrot.slane %v662_v48, 9  ;;  %v2634_v19 = vld [vmem:[%s2540_s17 + $0x60] sm:$0xf]  ;;  %v192_v35 = vld [vmem:[%s2540_s17 + $0x78] sm:$0xf] }
  0x1e   : > { %1070 = vrot.lane.b32.xlu1 %v2592_v40, %s2499_s19  ;;  %v748_v53 = vrot.slane %v209_v44, 5  ;;  %v2149_v56 = vcombine.low %v739_v46, %v742_v50  ;;  %v805_v57 = vsel %vm2572_vm4, %v803_v32, %v804_v47  ;;  %v265_v58 = vrot.slane %v263_v8, 5  ;;  %v2659_v48 = vld [vmem:[%s2540_s17 + $0x7c] sm:$0xf] }
  0x1f   : > { %v273_v59 = vshll.u32 %v209_v44, 16  ;;  %v2615_v60 = vcombine.low %v802_v51, %v805_v57  ;;  %v746_v61 = vsel %vm2572_vm4, %v2100_v52, %v745_v28  ;;  %v230_v63 = vshrl.u32 %v2611_v55, 16 }
  0x20   : > { %v749_v62 = vsel %vm2572_vm4, %v747_v49, %v748_v53  ;;  %1054 = vrot.lane.b32.xlu0 %v2149_v56, %s2499_s19  ;;  %v266_v2 = vsel %vm2606_vm5, %v261_v45, %v265_v58  ;;  %v270_v5 = vor.u32 %v269_v18, %v265_v58  ;;  %v233_v8 = vshll.u32 %v2611_v55, 16  ;;  %v176_v56 = vld [vmem:[%s2540_s17 + $0x18] sm:$0xf] }
  0x21   : > { %3684 = vst [vmem:[#allocation2_spill] sm:$0xff] %v2615_v60  ;;  %v2623_v0 = vcombine.low %v746_v61, %v749_v62  ;;  %v275_v6 = vrot.slane %v273_v59, 5  ;;  %v232_v7 = vrot.slane %v230_v63, 4  ;;  %v239_v9 = vshll.u32 %v2579_v27, 16 }
  0x22   : > { %1072 = vrot.lane.b32.xlu1 %v2615_v60, %s2499_s19  ;;  %v243_v11 = vshrl.u32 %v2579_v27, 16  ;;  %v271_v13 = vrot.slane %v270_v5, 4  ;;  %v249_v14 = vshll.u32 %v208_v29, 16  ;;  %v453_v15 = vrot.slane %v452_v33, 4 }
  0x23   : > { %v455_v17 = vshll.u32 %v2544_v1, 16  ;;  %v235_v20 = vrot.slane %v233_v8, 5  ;;  %v241_v18 = vrot.slane %v239_v9, 5  ;;  %v461_v23 = vrot.slane %v459_v3, 4  ;;  %v218_v9 = vld [vmem:[%s2540_s17 + $0x80] sm:$0x1] }
  0x24   : > { %v245_v22 = vrot.slane %v243_v11, 4  ;;  %1056 = vrot.lane.b32.xlu0 %v2623_v0, %s2499_s19  ;;  %v276_v24 = vsel %vm2606_vm5, %v271_v13, %v275_v6  ;;  %v251_v25 = vrot.slane %v249_v14, 5  ;;  %v465_v28 = vshll.u32 %v217_v38, 16 }
  0x25   : > { %v457_v26 = vrot.slane %v455_v17, 5  ;;  %v2642_v29 = vcombine.low %v266_v2, %v276_v24  ;;  %v236_v30 = vor.u32 %v235_v20, %v232_v7  ;;  %v422_v32 = vshrl.u32 %v2634_v19, 16 }
  0x26   : > { %v246_v31 = vor.u32 %v245_v22, %v241_v18  ;;  %v467_v3 = vrot.slane %v465_v28, 5  ;;  %v425_v34 = vshll.u32 %v2634_v19, 16  ;;  %v431_v39 = vshll.u32 %v2555_v12, 16  ;;  %v2682_v22 = vld [vmem:[%s2540_s17 + $0x20] sm:$0x1] }
  0x27   : > { %v458_v33 = vsel %vm2606_vm5, %v453_v15, %v457_v26  ;;  %v462_v1 = vor.u32 %v461_v23, %v457_v26  ;;  %976 = vrot.lane.b32.xlu1 %v2642_v29, %s2500_s20  ;;  %v237_v36 = vrot.slane %v236_v30, 4  ;;  %v424_v38 = vrot.slane %v422_v32, 4 }
  0x28   : > { %v247_v37 = vrot.slane %v246_v31, 4  ;;  %v427_v42 = vrot.slane %v425_v34, 5  ;;  %v435_v43 = vshrl.u32 %v2555_v12, 16  ;;  %v441_v44 = vshll.u32 %v2564_v16, 16  ;;  %v2665_v12 = vld [vmem:[%s2540_s17 + $0x1c] sm:$0xf] }
  0x29   : > { %v463_v41 = vrot.slane %v462_v1, 4  ;;  %v242_v45 = vsel %vm2606_vm5, %v237_v36, %v241_v18  ;;  %v433_v47 = vrot.slane %v431_v39, 5  ;;  %v470_v49 = vshrl.u32 %v192_v35, 16 }
  0x2a   : > { %v252_v46 = vsel %vm2606_vm5, %v247_v37, %v251_v25  ;;  %v428_v52 = vor.u32 %v427_v42, %v424_v38  ;;  %v437_v53 = vrot.slane %v435_v43, 4  ;;  %v443_v57 = vrot.slane %v441_v44, 5 }
  0x2b   : > { %v2133_v50 = vcombine.low %v242_v45, %v252_v46  ;;  %v468_v51 = vsel %vm2606_vm5, %v463_v41, %v467_v3  ;;  %v472_v58 = vrot.slane %v470_v49, 4  ;;  %v473_v59 = vshll.u32 %v192_v35, 16  ;;  %v2475_v45 = vld [vmem:[%s3670_s1] sm:$0xff]  }
  0x2c   : > { %v2667_v16 = vcombine.low %v458_v33, %v468_v51  ;;  %v429_v61 = vrot.slane %v428_v52, 4  ;;  %v438_v62 = vor.u32 %v437_v53, %v433_v47  ;;  %v483_v63 = vshrl.u32 %v2659_v48, 16  ;;  %v2717_v53 = vld [vmem:[%s2540_s17 + $0x88] sm:$0xf]  ;;  %2382 = vmatprep.subr.bf16.mxu0 %v2475_v45  ;;  %2430 = vmatprep.subr.bf16.mxu1 %v2475_v45 }
  0x2d   : > { %974 = vrot.lane.b32.xlu0 %v2133_v50, %s2500_s20  ;;  %v2672_v2 = vcombine.low %v192_v35, %v2659_v48  ;;  %v475_v5 = vrot.slane %v473_v59, 5  ;;  %v278_v6 = vshrl.u32 %v176_v56, 16  ;;  %v281_v7 = vshll.u32 %v176_v56, 16  ;;  %v671_v35 = vld [vmem:[%s2540_s17 + $0x78] sm:$0xe]  ;;  %2383 = vmatpush3.bf16.msra.mxu0 %v2475_v45 }
  0x2e   : > { %3685 = vst [vmem:[#allocation3_spill] sm:$0xff] %v2667_v16  ;;  %992 = vrot.lane.b32.xlu1 %v2667_v16, %s2500_s20  ;;  %v291_v8 = vshrl.u32 %v2665_v12, 16  ;;  %v434_v11 = vsel %vm2606_vm5, %v429_v61, %v433_v47  ;;  %v439_v13 = vrot.slane %v438_v62, 4  ;;  %v479_v14 = vshll.u32 %v2659_v48, 16  ;;  %v2709_v50 = vld [vmem:[%s2540_s17 + $0x84] sm:$0xf]  ;;  %2438 = vmatpush3.bf16.msra.mxu1 %v2475_v45 }
  0x2f   : > { %v280_v15 = vrot.slane %v278_v6, 4  ;;  %v283_v17 = vrot.slane %v281_v7, 5  ;;  %v476_v20 = vor.u32 %v475_v5, %v472_v58  ;;  %v485_v18 = vrot.slane %v483_v63, 4  ;;  %v663_v58 = vld [vmem:[%s2540_s17 + $0x18] sm:$0xe] }
  0x30   : > { %v444_v23 = vsel %vm2606_vm5, %v439_v13, %v443_v57  ;;  %v481_v24 = vrot.slane %v479_v14, 5  ;;  %v489_v25 = vshll.u32 %v218_v9, 16  ;;  %v287_v26 = vshll.u32 %v2665_v12, 16  ;;  %v178_v14 = vld [vmem:[%s2540_s17 + $0x24] sm:$0xf] }
  0x31   : > { %v2687_v28 = vcombine.low %v434_v11, %v444_v23  ;;  %v477_v30 = vrot.slane %v476_v20, 4  ;;  %v284_v31 = vor.u32 %v283_v17, %v280_v15  ;;  %v293_v32 = vrot.slane %v291_v8, 4  ;;  %v2479_v15 = vld [vmem:[%s3670_s1 + $0x10] sm:$0xff]  }
  0x32   : > { %1108 = vrot.lane.b32.xlu1 %v2672_v2, %s2498_s18  ;;  %v486_v33 = vor.u32 %v485_v18, %v481_v24  ;;  %v491_v1 = vrot.slane %v489_v25, 5  ;;  %v289_v3 = vrot.slane %v287_v26, 5  ;;  %v297_v34 = vshll.u32 %v2682_v22, 16  ;;  %v2760_v25 = vld [vmem:[%s2540_s17 + $0x8c] sm:$0x1] }
  0x33   : > { %990 = vrot.lane.b32.xlu0 %v2687_v28, %s2500_s20  ;;  %v2696_v36 = vcombine.low %v176_v56, %v2665_v12  ;;  %v482_v37 = vsel %vm2606_vm5, %v477_v30, %v481_v24  ;;  %v808_v38 = vrot.slane %v2659_v48, 5  ;;  %v285_v41 = vrot.slane %v284_v31, 4 }
  0x34   : > { %v487_v39 = vrot.slane %v486_v33, 4  ;;  %v294_v42 = vor.u32 %v293_v32, %v289_v3  ;;  %v299_v43 = vrot.slane %v297_v34, 5  ;;  %v2109_v44 = vrot.slane %v671_v35, 9  ;;  %v2480_v33 = vld [vmem:[%s3670_s1 + $0x18] sm:$0xff]  }
  0x35   : > { %v810_v48 = vrot.slane %v808_v38, 4  ;;  %v811_v49 = vrot.slane %v218_v9, 5  ;;  %v752_v52 = vrot.slane %v2665_v12, 5  ;;  %v290_v56 = vsel %vm2606_vm5, %v285_v41, %v289_v3  ;;  %v2478_v12 = vld [vmem:[%s3670_s1 + $0x8] sm:$0xff]  }
  0x36   : > { %1141 = vrot.lane.b32.xlu1 %v2667_v16, %s2501_s21  ;;  %v492_v46 = vsel %vm2606_vm5, %v487_v39, %v491_v1  ;;  %v295_v47 = vrot.slane %v294_v42, 4  ;;  %v494_v59 = vshrl.u32 %v2709_v50, 16  ;;  %v809_v61 = vsel %vm2572_vm4, %v2109_v44, %v808_v38  ;;  %2384 = vmatprep.subr.bf16.mxu0 %v2478_v12 }
  0x37   : > { %1092 = vrot.lane.b32.xlu0 %v2696_v36, %s2498_s18  ;;  %v2713_v51 = vcombine.low %v482_v37, %v492_v46  ;;  %v812_v62 = vsel %vm2572_vm4, %v810_v48, %v811_v49  ;;  %v497_v63 = vshll.u32 %v2709_v50, 16  ;;  %v507_v5 = vshrl.u32 %v2717_v53, 16  ;;  %2431 = vmatprep.subr.bf16.mxu1 %v2478_v12 }
  0x38   : > { %v300_v57 = vsel %vm2606_vm5, %v295_v47, %v299_v43  ;;  %v2101_v7 = vrot.slane %v663_v58, 9  ;;  %v754_v8 = vrot.slane %v752_v52, 4  ;;  %v755_v9 = vrot.slane %v2682_v22, 5  ;;  %2385 = vmatpush3.bf16.msra.mxu0 %v2478_v12  ;;  %2439 = vmatpush3.bf16.msra.mxu1 %v2478_v12  ;;  %v2781_v43 = vld [vmem:[%s2540_s17 + $0x2c] sm:$0x1] }
  0x39   : > { %v2738_v6 = vcombine.low %v290_v56, %v300_v57  ;;  %v503_v11 = vshll.u32 %v2717_v53, 16  ;;  %v2744_v13 = vcombine.low %v809_v61, %v812_v62  ;;  %v496_v17 = vrot.slane %v494_v59, 4  ;;  %2386 = vmatprep.subr.bf16.mxu0 %v2479_v15  ;;  %2432 = vmatprep.subr.bf16.mxu1 %v2479_v15  ;;  %v2483_v62 = vld [vmem:[%s3670_s1 + $0x30] sm:$0xff]  }
  0x3a   : > { %1143 = vrot.lane.b32.xlu1 %v2713_v51, %s2501_s21  ;;  %v499_v20 = vrot.slane %v497_v63, 5  ;;  %v509_v22 = vrot.slane %v507_v5, 4  ;;  %v753_v23 = vsel %vm2572_vm4, %v2101_v7, %v752_v52  ;;  %v756_v24 = vsel %vm2572_vm4, %v754_v8, %v755_v9  ;;  %v672_v5 = vld [vmem:[%s2540_s17 + $0x84] sm:$0xe] }
  0x3b   : > { %1125 = vrot.lane.b32.xlu0 %v2642_v29, %s2501_s21  ;;  %v2748_v29 = vld [vmem:[%s2540_s17 + $0x28] sm:$0xf]  ;;  %v505_v18 = vrot.slane %v503_v11, 5  ;;  %v302_v26 = vshrl.u32 %v178_v14, 16  ;;  %v305_v30 = vshll.u32 %v178_v14, 16  ;;  %v513_v34 = vshll.u32 %v2760_v25, 16 }
  0x3c   : > { %v315_v31 = vshrl.u32 %v2748_v29, 16  ;;  %v311_v32 = vshll.u32 %v2748_v29, 16  ;;  %2387 = vmatpush3.bf16.msra.mxu0 %v2479_v15  ;;  %2440 = vmatpush3.bf16.msra.mxu1 %v2479_v15  ;;  %v500_v1 = vor.u32 %v499_v20, %v496_v17  ;;  %v2772_v35 = vcombine.low %v753_v23, %v756_v24  ;;  %v664_v20 = vld [vmem:[%s2540_s17 + $0x24] sm:$0xe] }
  0x3d   : > { %v510_v3 = vor.u32 %v509_v22, %v505_v18  ;;  %2388 = vmatprep.subr.bf16.mxu0 %v2480_v33  ;;  %v304_v37 = vrot.slane %v302_v26, 4  ;;  %v307_v38 = vrot.slane %v305_v30, 5  ;;  %2433 = vmatprep.subr.bf16.mxu1 %v2480_v33  ;;  %v2778_v42 = vcombine.low %v2709_v50, %v2717_v53  ;;  %v2482_v50 = vld [vmem:[%s3670_s1 + $0x28] sm:$0xff]  }
  0x3e   : > { %1176 = vrot.lane.b32.xlu1 %v2615_v60, %s2502_s26  ;;  %v313_v39 = vrot.slane %v311_v32, 5  ;;  %v317_v41 = vrot.slane %v315_v31, 4  ;;  %v501_v44 = vrot.slane %v500_v1, 4  ;;  %v515_v46 = vrot.slane %v513_v34, 5  ;;  %v196_v32 = vld [vmem:[%s2540_s17 + $0x90] sm:$0xf] }
  0x3f   : > { %1127 = vrot.lane.b32.xlu0 %v2738_v6, %s2501_s21  ;;  %v511_v45 = vrot.slane %v510_v3, 4  ;;  %v308_v47 = vor.u32 %v307_v38, %v304_v37  ;;  %v321_v49 = vshll.u32 %v2781_v43, 16  ;;  %v2801_v57 = vcombine.low %v178_v14, %v2748_v29  ;;  %v2871_v38 = vld [vmem:[%s2540_s17 + $0x34] sm:$0xf] }
  0x40   : > { %2389 = vmatpush3.bf16.msra.mxu0 %v2480_v33  ;;  %2441 = vmatpush3.bf16.msra.mxu1 %v2480_v33  ;;  %v318_v48 = vor.u32 %v317_v41, %v313_v39  ;;  %v506_v52 = vsel %vm2606_vm5, %v501_v44, %v505_v18  ;;  %v815_v63 = vrot.slane %v2717_v53, 5  ;;  %v2486_v53 = vld [vmem:[%s3670_s1 + $0x38] sm:$0xff]   ;;  %v2110_v9 = vrot.slane %v672_v5, 9  ;;  %v2859_v33 = vld [vmem:[%s2540_s17 + $0x94] sm:$0xf] }
  0x41   : > { %v516_v56 = vsel %vm2606_vm5, %v511_v45, %v515_v46  ;;  %3686 = vst [vmem:[#allocation4_spill] sm:$0xff] %v2801_v57  ;;  %v309_v58 = vrot.slane %v308_v47, 4  ;;  %v323_v12 = vrot.slane %v321_v49, 5  ;;  %v818_v14 = vrot.slane %v2760_v25, 5  ;;  %v220_v44 = vld [vmem:[%s2540_s17 + $0x98] sm:$0x1] }
  0x42   : > { %1178 = vrot.lane.b32.xlu1 %v2744_v13, %s2502_s26  ;;  %v319_v59 = vrot.slane %v318_v48, 4  ;;  %v2805_v61 = vcombine.low %v506_v52, %v516_v56  ;;  %v817_v11 = vrot.slane %v815_v63, 4  ;;  %v759_v17 = vrot.slane %v2748_v29, 5 }
  0x43   : > { %1160 = vrot.lane.b32.xlu0 %v2623_v0, %s2502_s26  ;;  %v2481_v0 = vld [vmem:[%s3670_s1 + $0x20] sm:$0xff]   ;;  %v314_v7 = vsel %vm2606_vm5, %v309_v58, %v313_v39  ;;  %v816_v18 = vsel %vm2572_vm4, %v2110_v9, %v815_v63  ;;  %v2102_v29 = vrot.slane %v664_v20, 9  ;;  %v762_v24 = vrot.slane %v2781_v43, 5 }
  0x44   : > { %2390 = vmatprep.subr.bf16.mxu0 %v2481_v0  ;;  %2434 = vmatprep.subr.bf16.mxu1 %v2481_v0  ;;  %v324_v8 = vsel %vm2606_vm5, %v319_v59, %v323_v12  ;;  %v819_v22 = vsel %vm2572_vm4, %v817_v11, %v818_v14  ;;  %v761_v23 = vrot.slane %v759_v17, 4  ;;  %v518_v1 = vshrl.u32 %v196_v32, 16  ;;  %v673_v14 = vld [vmem:[%s2540_s17 + $0x90] sm:$0xe] }
  0x45   : > { %2391 = vmatpush3.bf16.msra.mxu0 %v2481_v0  ;;  %2442 = vmatpush3.bf16.msra.mxu1 %v2481_v0  ;;  %v2826_v15 = vcombine.low %v314_v7, %v324_v8  ;;  %v2843_v26 = vcombine.low %v816_v18, %v819_v22  ;;  %v760_v30 = vsel %vm2572_vm4, %v2102_v29, %v759_v17  ;;  %v521_v3 = vshll.u32 %v196_v32, 16 }
  0x46   : > { %1212 = vrot.lane.b32.xlu1 %v2672_v2, %s2503_s4  ;;  %2392 = vmatprep.subr.bf16.mxu0 %v2482_v50  ;;  %v763_v31 = vsel %vm2572_vm4, %v761_v23, %v762_v24  ;;  %v531_v34 = vshrl.u32 %v2859_v33, 16  ;;  %v527_v37 = vshll.u32 %v2859_v33, 16  ;;  %v520_v39 = vrot.slane %v518_v1, 4  ;;  %v2912_v1 = vld [vmem:[%s2540_s17 + $0xa0] sm:$0xf] }
  0x47   : > { %1162 = vrot.lane.b32.xlu0 %v2772_v35, %s2502_s26  ;;  %2435 = vmatprep.subr.bf16.mxu1 %v2482_v50  ;;  %v523_v41 = vrot.slane %v521_v3, 5  ;;  %v339_v47 = vshrl.u32 %v2871_v38, 16  ;;  %v335_v48 = vshll.u32 %v2871_v38, 16  ;;  %v2885_v12 = vcombine.low %v196_v32, %v2859_v33  ;;  %v198_v32 = vld [vmem:[%s2540_s17 + $0x9c] sm:$0xf] }
  0x48   : > { %v529_v43 = vrot.slane %v527_v37, 5  ;;  %v533_v0 = vrot.slane %v531_v34, 4  ;;  %v822_v17 = vrot.slane %v2859_v33, 5  ;;  %v2111_v24 = vrot.slane %v673_v14, 9 }
  0x49   : > { %2393 = vmatpush3.bf16.msra.mxu0 %v2482_v50  ;;  %2443 = vmatpush3.bf16.msra.mxu1 %v2482_v50  ;;  %v537_v50 = vshll.u32 %v220_v44, 16  ;;  %v337_v58 = vrot.slane %v335_v48, 5  ;;  %v341_v59 = vrot.slane %v339_v47, 4  ;;  %3687 = vst [vmem:[#allocation5_spill] sm:$0xff] %v2885_v12  ;;  %v766_v33 = vrot.slane %v2871_v38, 5 }
  0x4a   : > { %1214 = vrot.lane.b32.xlu1 %v2778_v42, %s2503_s4  ;;  %2394 = vmatprep.subr.bf16.mxu0 %v2483_v62  ;;  %v534_v49 = vor.u32 %v533_v0, %v529_v43  ;;  %v823_v37 = vsel %vm2572_vm4, %v2111_v24, %v822_v17  ;;  %v182_v48 = vld [vmem:[%s2540_s17 + $0x3c] sm:$0xf] }
  0x4b   : > { %1196 = vrot.lane.b32.xlu0 %v2696_v36, %s2503_s4  ;;  %2436 = vmatprep.subr.bf16.mxu1 %v2483_v62  ;;  %v539_v7 = vrot.slane %v537_v50, 5 }
  0x4c   : > { %v535_v5 = vrot.slane %v534_v49, 4 }
  0x4d   : > { %2395 = vmatpush3.bf16.msra.mxu0 %v2483_v62  ;;  %2444 = vmatpush3.bf16.msra.mxu1 %v2483_v62  ;;  %v212_v62 = vld [vmem:[%s2540_s17 + $0x38] sm:$0x1] }
  0x4e   : > { %1247 = vrot.lane.b32.xlu1 %v2713_v51, %s2504_s9  ;;  %2396 = vmatprep.subr.bf16.mxu0 %v2486_v53  ;;  %v540_v11 = vsel %vm2606_vm5, %v535_v5, %v539_v7 }
  0x4f   : > { %1198 = vrot.lane.b32.xlu0 %v2801_v57, %s2503_s4  ;;  %2437 = vmatprep.subr.bf16.mxu1 %v2486_v53 }
  0x51   : > { %2397 = vmatpush3.bf16.msra.mxu0 %v2486_v53  ;;  %2445 = vmatpush3.bf16.msra.mxu1 %v2486_v53  ;;  %v345_v53 = vshll.u32 %v212_v62, 16 }
  0x52   : > { %1249 = vrot.lane.b32.xlu1 %v2805_v61, %s2504_s9 }
  0x53   : > { %1231 = vrot.lane.b32.xlu0 %v2738_v6, %s2504_s9  ;;  %v347_v29 = vrot.slane %v345_v53, 5 }
  0x56   : > { %1282 = vrot.lane.b32.xlu1 %v2744_v13, %s2505_s16 }
  0x57   : > { %1233 = vrot.lane.b32.xlu0 %v2826_v15, %s2504_s9 }
  0x5a   : > { %994 = vrot.lane.b32.xlu1 %v2713_v51, %s2500_s20  ;;  %v2855_v51 = vcombine.low %v760_v30, %v763_v31  ;;  %v824_v30 = vrot.slane %v822_v17, 4  ;;  %v825_v31 = vrot.slane %v220_v44, 5 }
  0x5b   : > { %1266 = vrot.lane.b32.xlu0 %v2772_v35, %s2505_s16 }
  0x5e   : > { %1284 = vrot.lane.b32.xlu1 %v2843_v26, %s2505_s16 }
  0x5f   : > { %978 = vrot.lane.b32.xlu0 %v2738_v6, %s2500_s20  ;;  %v180_v6 = vld [vmem:[%s2540_s17 + $0x30] sm:$0xf] }
  0x60   : > { %v326_v45 = vshrl.u32 %v180_v6, 16  ;;  %v329_v46 = vshll.u32 %v180_v6, 16  ;;  %v2901_v20 = vcombine.low %v180_v6, %v2871_v38  ;;  %v542_v6 = vshrl.u32 %v198_v32, 16 }
  0x61   : > { %v826_v38 = vsel %vm2572_vm4, %v824_v30, %v825_v31 }
  0x62   : > { %996 = vrot.lane.b32.xlu1 %v2805_v61, %s2500_s20  ;;  %v328_v52 = vrot.slane %v326_v45, 4  ;;  %v331_v56 = vrot.slane %v329_v46, 5  ;;  %3688 = vst [vmem:[#allocation6_spill] sm:$0xff] %v2901_v20  ;;  %v768_v45 = vrot.slane %v766_v33, 4  ;;  %v769_v46 = vrot.slane %v212_v62, 5 }
  0x63   : > { %1268 = vrot.lane.b32.xlu0 %v2855_v51, %s2505_s16  ;;  %v2933_v47 = vcombine.low %v823_v37, %v826_v38  ;;  %v544_v49 = vrot.slane %v542_v6, 4  ;;  %v353_v62 = vshll.u32 %v182_v48, 16 }
  0x64   : > { %v332_v8 = vor.u32 %v331_v56, %v328_v52 }
  0x66   : > { %1074 = vrot.lane.b32.xlu1 %v2744_v13, %s2499_s19  ;;  %v524_v13 = vor.u32 %v523_v41, %v520_v39  ;;  %v333_v18 = vrot.slane %v332_v8, 4  ;;  %v545_v39 = vshll.u32 %v198_v32, 16  ;;  %v555_v41 = vshrl.u32 %v2912_v1, 16 }
  0x67   : > { %980 = vrot.lane.b32.xlu0 %v2826_v15, %s2500_s20 }
  0x68   : > { %v525_v63 = vrot.slane %v524_v13, 4  ;;  %v338_v3 = vsel %vm2606_vm5, %v333_v18, %v337_v58  ;;  %v2937_v13 = vld [vmem:[%s2540_s17 + $0x40] sm:$0xf]  ;;  %v547_v50 = vrot.slane %v545_v39, 5  ;;  %v557_v56 = vrot.slane %v555_v41, 4 }
  0x69   : > { %v359_v5 = vshll.u32 %v2937_v13, 16  ;;  %v2957_v18 = vcombine.low %v198_v32, %v2912_v1 }
  0x6a   : > { %1076 = vrot.lane.b32.xlu1 %v2843_v26, %s2499_s19  ;;  %v530_v9 = vsel %vm2606_vm5, %v525_v63, %v529_v43  ;;  %v551_v43 = vshll.u32 %v2912_v1, 16  ;;  %v363_v63 = vshrl.u32 %v2937_v13, 16  ;;  %v548_v7 = vor.u32 %v547_v50, %v544_v49 }
  0x6b   : > { %1058 = vrot.lane.b32.xlu0 %v2772_v35, %s2499_s19  ;;  %v342_v35 = vor.u32 %v341_v59, %v337_v58  ;;  %v2905_v23 = vcombine.low %v530_v9, %v540_v11  ;;  %v770_v58 = vsel %vm2572_vm4, %v768_v45, %v769_v46  ;;  %v221_v59 = vld [vmem:[%s2540_s17 + $0xa4] sm:$0x1]  ;;  %v355_v11 = vrot.slane %v353_v62, 5  ;;  %3689 = vst [vmem:[#allocation7_spill] sm:$0xff] %v2957_v18  ;;  %v674_v45 = vld [vmem:[%s2540_s17 + $0x9c] sm:$0xe] }
  0x6c   : > { %v553_v52 = vrot.slane %v551_v43, 5  ;;  %v361_v14 = vrot.slane %v359_v5, 5  ;;  %v365_v17 = vrot.slane %v363_v63, 4  ;;  %v829_v43 = vrot.slane %v2912_v1, 5 }
  0x6d   : > { %v343_v22 = vrot.slane %v342_v35, 4  ;;  %v561_v35 = vshll.u32 %v221_v59, 16  ;;  %v2112_v49 = vrot.slane %v674_v45, 9 }
  0x6e   : > { %1110 = vrot.lane.b32.xlu1 %v2778_v42, %s2498_s18  ;;  %v558_v8 = vor.u32 %v557_v56, %v553_v52  ;;  %v366_v31 = vor.u32 %v365_v17, %v361_v14  ;;  %v831_v50 = vrot.slane %v829_v43, 4 }
  0x6f   : > { %1060 = vrot.lane.b32.xlu0 %v2855_v51, %s2499_s19  ;;  %v348_v34 = vsel %vm2606_vm5, %v343_v22, %v347_v29  ;;  %v213_v22 = vld [vmem:[%s2540_s17 + $0x44] sm:$0x1]  ;;  %v549_v29 = vrot.slane %v548_v7, 4  ;;  %v563_v30 = vrot.slane %v561_v35, 5  ;;  %v830_v62 = vsel %vm2572_vm4, %v2112_v49, %v829_v43 }
  0x70   : > { %v2929_v0 = vcombine.low %v338_v3, %v348_v34  ;;  %v559_v24 = vrot.slane %v558_v8, 4  ;;  %v367_v6 = vrot.slane %v366_v31, 4  ;;  %v776_v7 = vrot.slane %v213_v22, 5 }
  0x71   : > { %v554_v32 = vsel %vm2606_vm5, %v549_v29, %v553_v52  ;;  %v832_v52 = vrot.slane %v221_v59, 5  ;;  %v3037_v29 = vld [vmem:[%s2540_s17 + $0xac] sm:$0xf] }
  0x72   : > { %1112 = vrot.lane.b32.xlu1 %v2885_v12, %s2498_s18  ;;  %v564_v34 = vsel %vm2606_vm5, %v559_v24, %v563_v30 }
  0x73   : > { %1094 = vrot.lane.b32.xlu0 %v2801_v57, %s2498_s18  ;;  %v2979_v41 = vcombine.low %v554_v32, %v564_v34  ;;  %v833_v59 = vsel %vm2572_vm4, %v831_v50, %v832_v52  ;;  %v184_v32 = vld [vmem:[%s2540_s17 + $0x48] sm:$0xf]  ;;  %v3053_v34 = vld [vmem:[%s2540_s17 + $0x4c] sm:$0xf] }
  0x74   : > { %v3017_v35 = vcombine.low %v830_v62, %v833_v59  ;;  %v377_v49 = vshll.u32 %v184_v32, 16  ;;  %v387_v50 = vshrl.u32 %v3053_v34, 16 }
  0x76   : > { %1145 = vrot.lane.b32.xlu1 %v2805_v61, %s2501_s21  ;;  %v665_v61 = vld [vmem:[%s2540_s17 + $0x30] sm:$0xe] }
  0x77   : > { %1096 = vrot.lane.b32.xlu0 %v2901_v20, %s2498_s18  ;;  %v2103_v44 = vrot.slane %v665_v61, 9  ;;  %v2973_v61 = vcombine.low %v182_v48, %v2937_v13 }
  0x79   : > { %3690 = vst [vmem:[#allocation8_spill] sm:$0xff] %v2973_v61 }
  0x7a   : > { %1147 = vrot.lane.b32.xlu1 %v2905_v23, %s2501_s21 }
  0x7b   : > { %1129 = vrot.lane.b32.xlu0 %v2826_v15, %s2501_s21  ;;  %v767_v15 = vsel %vm2572_vm4, %v2103_v44, %v766_v33  ;;  %v369_v33 = vshll.u32 %v213_v22, 16  ;;  %v200_v22 = vld [vmem:[%s2540_s17 + $0xa8] sm:$0xf] }
  0x7c   : > { %v2952_v53 = vcombine.low %v767_v15, %v770_v58  ;;  %v773_v58 = vrot.slane %v2937_v13, 5  ;;  %v566_v24 = vshrl.u32 %v200_v22, 16  ;;  %v569_v30 = vshll.u32 %v200_v22, 16 }
  0x7d   : > { %v371_v38 = vrot.slane %v369_v33, 5 }
  0x7e   : > { %1180 = vrot.lane.b32.xlu1 %v2843_v26, %s2502_s26  ;;  %v350_v26 = vshrl.u32 %v182_v48, 16  ;;  %v775_v5 = vrot.slane %v773_v58, 4 }
  0x7f   : > { %1131 = vrot.lane.b32.xlu0 %v2929_v0, %s2501_s21  ;;  %v372_v48 = vsel %vm2606_vm5, %v367_v6, %v371_v38  ;;  %v571_v6 = vrot.slane %v569_v30, 5  ;;  %v3081_v30 = vld [vmem:[%s2540_s17 + $0x50] sm:$0x1] }
  0x80   : > { %v352_v9 = vrot.slane %v350_v26, 4  ;;  %v666_v26 = vld [vmem:[%s2540_s17 + $0x3c] sm:$0xe] }
  0x81   : > { %v2104_v63 = vrot.slane %v666_v26, 9 }
  0x82   : > { %1182 = vrot.lane.b32.xlu1 %v2933_v47, %s2502_s26 }
  0x83   : > { %1164 = vrot.lane.b32.xlu0 %v2855_v51, %s2502_s26  ;;  %v356_v51 = vor.u32 %v355_v11, %v352_v9  ;;  %v774_v9 = vsel %vm2572_vm4, %v2104_v63, %v773_v58  ;;  %v777_v11 = vsel %vm2572_vm4, %v775_v5, %v776_v7  ;;  %v379_v5 = vrot.slane %v377_v49, 5 }
  0x85   : > { %v357_v37 = vrot.slane %v356_v51, 4  ;;  %v579_v51 = vshrl.u32 %v3037_v29, 16 }
  0x86   : > { %1216 = vrot.lane.b32.xlu1 %v2885_v12, %s2503_s4  ;;  %v783_v12 = vrot.slane %v3081_v30, 5 }
  0x87   : > { %1166 = vrot.lane.b32.xlu0 %v2952_v53, %s2502_s26  ;;  %v362_v46 = vsel %vm2606_vm5, %v357_v37, %v361_v14  ;;  %v3031_v14 = vcombine.low %v774_v9, %v777_v11  ;;  %v568_v37 = vrot.slane %v566_v24, 4  ;;  %v581_v43 = vrot.slane %v579_v51, 4 }
  0x88   : > { %v2964_v3 = vpop.permute.xlu1 %1106  ;;  %v2995_v1 = vcombine.low %v362_v46, %v372_v48  ;;  %v3060_v46 = vld [vmem:[%s2540_s17 + $0xb0] sm:$0x1]  ;;  %v374_v48 = vshrl.u32 %v184_v32, 16  ;;  %v389_v9 = vrot.slane %v387_v50, 4  ;;  %v3078_v24 = vcombine.low %v200_v22, %v3037_v29 }
  0x89   : > { %v572_v58 = vor.u32 %v571_v6, %v568_v37  ;;  %v585_v62 = vshll.u32 %v3060_v46, 16 }
  0x8a   : > { %1218 = vrot.lane.b32.xlu1 %v2957_v18, %s2503_s4  ;;  %v2977_v39 = vpop.permute.xlu0 %1090  ;;  %v376_v63 = vrot.slane %v374_v48, 4  ;;  %v393_v48 = vshll.u32 %v3081_v30, 16 }
  0x8b   : > { %1200 = vrot.lane.b32.xlu0 %v2901_v20, %s2503_s4  ;;  %v573_v51 = vrot.slane %v572_v58, 4  ;;  %v3100_v58 = vcombine.low %v184_v32, %v3053_v34  ;;  %v839_v32 = vrot.slane %v3060_v46, 5 }
  0x8c   : > { %v380_v6 = vor.u32 %v379_v5, %v376_v63 }
  0x8e   : > { %1251 = vrot.lane.b32.xlu1 %v2905_v23, %s2504_s9  ;;  %v381_v63 = vrot.slane %v380_v6, 4 }
  0x8f   : > { %1202 = vrot.lane.b32.xlu0 %v2973_v61, %s2503_s4 }
  0x90   : > { %v2984_v44 = vpop.permute.xlu1 %1070 }
  0x92   : > { %1253 = vrot.lane.b32.xlu1 %v2979_v41, %s2504_s9  ;;  %v2997_v56 = vpop.permute.xlu0 %1054 }
  0x93   : > { %1235 = vrot.lane.b32.xlu0 %v2929_v0, %s2504_s9 }
  0x94   : > { %v2999_v15 = vpop.permute.xlu1 %1072 }
  0x96   : > { %1286 = vrot.lane.b32.xlu1 %v2933_v47, %s2505_s16  ;;  %v3011_v8 = vpop.permute.xlu0 %1056 }
  0x97   : > { %1237 = vrot.lane.b32.xlu0 %v2995_v1, %s2504_s9 }
  0x99   : > { %v3015_v13 = vpop.permute.xlu1 %976 }
  0x9a   : > { %998 = vrot.lane.b32.xlu1 %v2905_v23, %s2500_s20 }
  0x9b   : > { %1270 = vrot.lane.b32.xlu0 %v2952_v53, %s2505_s16 }
  0x9e   : > { %1288 = vrot.lane.b32.xlu1 %v3017_v35, %s2505_s16 }
  0x9f   : > { %982 = vrot.lane.b32.xlu0 %v2929_v0, %s2500_s20  ;;  %v3029_v23 = vpop.permute.xlu0 %974  ;;  %v575_v0 = vshll.u32 %v3037_v29, 16 }
  0xa0   : > { %v3033_v17 = vpop.permute.xlu1 %992 }
  0xa1   : > { %v577_v38 = vrot.slane %v575_v0, 5 }
  0xa2   : > { %1000 = vrot.lane.b32.xlu1 %v2979_v41, %s2500_s20 }
  0xa3   : > { %1272 = vrot.lane.b32.xlu0 %v3031_v14, %s2505_s16  ;;  %v582_v26 = vor.u32 %v581_v43, %v577_v38  ;;  %v578_v22 = vsel %vm2606_vm5, %v573_v51, %v577_v38  ;;  %v395_v38 = vrot.slane %v393_v48, 5  ;;  %v3121_v48 = vld [vmem:[%s2540_s17 + $0xb8] sm:$0xf] }
  0xa4   : > { %v3045_v31 = vpop.permute.xlu1 %1108 }
  0xa5   : > { %v3047_v33 = vpop.permute.xlu0 %990  ;;  %v583_v0 = vrot.slane %v582_v26, 4 }
  0xa6   : > { %1078 = vrot.lane.b32.xlu1 %v2933_v47, %s2499_s19  ;;  %v383_v47 = vshll.u32 %v3053_v34, 16 }
  0xa7   : > { %984 = vrot.lane.b32.xlu0 %v2995_v1, %s2500_s20 }
  0xa8   : > { %v3057_v45 = vpop.permute.xlu1 %1141  ;;  %v385_v7 = vrot.slane %v383_v47, 5  ;;  %v836_v47 = vrot.slane %v3037_v29, 5 }
  0xa9   : > { %v3064_v52 = vpop.permute.xlu0 %1092 }
  0xaa   : > { %1080 = vrot.lane.b32.xlu1 %v3017_v35, %s2499_s19  ;;  %v390_v43 = vor.u32 %v389_v9, %v385_v7 }
  0xab   : > { %1062 = vrot.lane.b32.xlu0 %v2952_v53, %s2499_s19  ;;  %v587_v53 = vrot.slane %v585_v62, 5  ;;  %v675_v62 = vld [vmem:[%s2540_s17 + $0xa8] sm:$0xe] }
  0xac   : > { %v3071_v59 = vpop.permute.xlu1 %1143  ;;  %v391_v5 = vrot.slane %v390_v43, 4  ;;  %v2113_v51 = vrot.slane %v675_v62, 9  ;;  %v780_v43 = vrot.slane %v3053_v34, 5  ;;  %v2489_v62 = vld [vmem:[%s2540_s17 + $0x64] sm:$0xf] }
  0xad   : > { %v3073_v11 = vpop.permute.xlu0 %1125  ;;  %v588_v50 = vsel %vm2606_vm5, %v583_v0, %v587_v53  ;;  %v838_v0 = vrot.slane %v836_v47, 4  ;;  %v3113_v53 = vld [vmem:[%s2540_s17 + $0xb4] sm:$0xf]  ;;  %v3130_v46 = vcombine.low %v2634_v19, %v2489_v62  ;;  %v599_v19 = vshll.u32 %v3121_v48, 16 }
  0xae   : > { %1114 = vrot.lane.b32.xlu1 %v2957_v18, %s2498_s18  ;;  %v3109_v29 = vcombine.low %v578_v22, %v588_v50  ;;  %v396_v22 = vsel %vm2606_vm5, %v391_v5, %v395_v38  ;;  %v667_v50 = vld [vmem:[%s2540_s17 + $0x48] sm:$0xe]  ;;  %v590_v34 = vshrl.u32 %v3113_v53, 16  ;;  %v603_v5 = vshrl.u32 %v3121_v48, 16 }
  0xaf   : > { %1064 = vrot.lane.b32.xlu0 %v3031_v14, %s2499_s19  ;;  %v2105_v18 = vrot.slane %v667_v50, 9  ;;  %v782_v20 = vrot.slane %v780_v43, 4  ;;  %v3166_v30 = vrot.slane %v599_v19, 5 }
  0xb0   : > { %v3085_v37 = vpop.permute.xlu1 %1176  ;;  %v605_v50 = vrot.slane %v603_v5, 4 }
  0xb1   : > { %v3088_v49 = vpop.permute.xlu0 %1127  ;;  %v781_v60 = vsel %vm2572_vm4, %v2105_v18, %v780_v43 }
  0xb2   : > { %1116 = vrot.lane.b32.xlu1 %v3078_v24, %s2498_s18  ;;  %v606_v43 = vor.u32 %v605_v50, %v3166_v30 }
  0xb3   : > { %1098 = vrot.lane.b32.xlu0 %v2973_v61, %s2498_s18  ;;  %v593_v61 = vshll.u32 %v3113_v53, 16 }
  0xb4   : > { %v3102_v26 = vpop.permute.xlu1 %1178 }
  0xb5   : > { %v3105_v9 = vpop.permute.xlu0 %1160 }
  0xb6   : > { %1149 = vrot.lane.b32.xlu1 %v2979_v41, %s2501_s21  ;;  %v386_v41 = vsel %vm2606_vm5, %v381_v63, %v385_v7  ;;  %v837_v7 = vsel %vm2572_vm4, %v2113_v51, %v836_v47  ;;  %v840_v63 = vsel %vm2572_vm4, %v838_v0, %v839_v32  ;;  %v3152_v47 = vld [vmem:[%s2540_s17 + $0x54] sm:$0xf]  ;;  %v1325_v51 = vsel %vm1298_vm6, %v3130_v46, %v3047_v33 }
  0xb7   : > { %1100 = vrot.lane.b32.xlu0 %v3100_v58, %s2498_s18  ;;  %v3146_v38 = vcombine.low %v386_v41, %v396_v22  ;;  %v592_v32 = vrot.slane %v590_v34, 4  ;;  %v595_v41 = vrot.slane %v593_v61, 5  ;;  %v3164_v22 = vld [vmem:[%s2540_s17 + $0x58] sm:$0xf]  ;;  %v401_v61 = vshll.u32 %v3152_v47, 16 }
  0xb8   : > { %v3117_v6 = vpop.permute.xlu1 %1212  ;;  %v3177_v34 = vld [vmem:[%s2540_s17 + $0xbc] sm:$0x1]  ;;  %v411_v5 = vshrl.u32 %v3164_v22, 16  ;;  %v407_v19 = vshll.u32 %v3164_v22, 16 }
  0xb9   : > { %v3132_v25 = vpop.permute.xlu0 %1162 }
  0xba   : > { %1151 = vrot.lane.b32.xlu1 %v3109_v29, %s2501_s21 }
  0xbb   : > { %1133 = vrot.lane.b32.xlu0 %v2995_v1, %s2501_s21  ;;  %v3161_v1 = vcombine.low %v837_v7, %v840_v63  ;;  %v398_v7 = vshrl.u32 %v3152_v47, 16  ;;  %v1365_v63 = vsel %vm1347_vm7, %v1325_v51, %v2984_v44  ;;  %v609_v44 = vshll.u32 %v3177_v34, 16 }
  0xbc   : > { %v3148_v62 = vpop.permute.xlu1 %1214  ;;  %v3691_v51 = vcombine.low %v2611_v55, %v2579_v27  ;;  %v1398_v57 = vsel %vm1380_vm8, %v1365_v63, %v2964_v3  ;;  %v3206_v27 = vrot.slane %v407_v19, 5  ;;  %v413_v55 = vrot.slane %v411_v5, 4 }
  0xbd   : > { %v3157_v0 = vpop.permute.xlu0 %1196  ;;  %v1431_v50 = vsel %vm1413_vm9, %v1398_v57, %v3057_v45 }
  0xbe   : > { %1184 = vrot.lane.b32.xlu1 %v3017_v35, %s2502_s26  ;;  %v784_v35 = vsel %vm2572_vm4, %v782_v20, %v783_v12  ;;  %v596_v12 = vor.u32 %v595_v41, %v592_v32  ;;  %v1301_v16 = vsel %vm1298_vm6, %v3691_v51, %v3029_v23  ;;  %v403_v41 = vrot.slane %v401_v61, 5 }
  0xbf   : > { %1135 = vrot.lane.b32.xlu0 %v3146_v38, %s2501_s21  ;;  %v3187_v20 = vcombine.low %v781_v60, %v784_v35  ;;  %v400_v60 = vrot.slane %v398_v7, 4  ;;  %v3204_v35 = vcombine.low %v3113_v53, %v3121_v48  ;;  %v1464_v23 = vsel %vm1446_vm10, %v1431_v50, %v3085_v37  ;;  %v3213_v7 = vld [vmem:[%s2540_s17 + $0x5c] sm:$0x1] }
  0xc0   : > { %v1248_v33 = vpop.permute.xlu1 %1247  ;;  %v1349_v57 = vsel %vm1347_vm7, %v1301_v16, %v2997_v56  ;;  %v1497_v45 = vsel %vm1479_vm11, %v1464_v23, %v3117_v6  ;;  %v607_v53 = vrot.slane %v606_v43, 4  ;;  %v611_v61 = vrot.slane %v609_v44, 5 }
  0xc1   : > { %v3183_v18 = vpop.permute.xlu0 %1198  ;;  %v1328_v37 = vsel %vm1298_vm6, %v2549_v4, %v3033_v17  ;;  %v1530_v63 = vsel %vm1512_vm12, %v1497_v45, %v1248_v33  ;;  %v404_v19 = vor.u32 %v403_v41, %v400_v60  ;;  %v414_v16 = vor.u32 %v413_v55, %v3206_v27 }
  0xc2   : > { %1186 = vrot.lane.b32.xlu1 %v3161_v1, %s2502_s26  ;;  %v417_v56 = vshll.u32 %v3213_v7, 16  ;;  %v1382_v6 = vsel %vm1380_vm8, %v1349_v57, %v2977_v39  ;;  %v1367_v17 = vsel %vm1347_vm7, %v1328_v37, %v2999_v15  ;;  %v612_v51 = vsel %vm2606_vm5, %v607_v53, %v611_v61 }
  0xc3   : > { %1168 = vrot.lane.b32.xlu0 %v3031_v14, %s2502_s26  ;;  %v597_v14 = vrot.slane %v596_v12, 4  ;;  %v1415_v33 = vsel %vm1413_vm9, %v1382_v6, %v3073_v11  ;;  %v1400_v39 = vsel %vm1380_vm8, %v1367_v17, %v3045_v31  ;;  %v3250_v15 = vcombine.low %v3152_v47, %v3164_v22 }
  0xc4   : > { %v1250_v32 = vpop.permute.xlu1 %1249  ;;  %v1448_v60 = vsel %vm1446_vm10, %v1415_v33, %v3105_v9  ;;  %v405_v41 = vrot.slane %v404_v19, 4  ;;  %v415_v31 = vrot.slane %v414_v16, 4  ;;  %v419_v55 = vrot.slane %v417_v56, 5 }
  0xc5   : > { %v1232_v3 = vpop.permute.xlu0 %1231  ;;  %v602_v44 = vsel %vm2606_vm5, %v597_v14, %v3166_v30  ;;  %v1433_v30 = vsel %vm1413_vm9, %v1400_v39, %v3071_v59  ;;  %v1481_v50 = vsel %vm1479_vm11, %v1448_v60, %v3157_v0  ;;  %v1304_v9 = vsel %vm1298_vm6, %v2552_v10, %v3015_v13 }
  0xc6   : > { %1220 = vrot.lane.b32.xlu1 %v3078_v24, %s2503_s4  ;;  %v1466_v47 = vsel %vm1446_vm10, %v1433_v30, %v3102_v26  ;;  %v1514_v23 = vsel %vm1512_vm12, %v1481_v50, %v1232_v3  ;;  %v3266_v59 = vcombine.low %v602_v44, %v612_v51  ;;  %v843_v45 = vrot.slane %v3121_v48, 5  ;;  %v676_v26 = vld [vmem:[%s2540_s17 + $0xb4] sm:$0xe]  ;;  %v204_v50 = vld [vmem:[%s2540_s17 + $0xc0] sm:$0xf] }
  0xc7   : > { %1170 = vrot.lane.b32.xlu0 %v3187_v20, %s2502_s26  ;;  %v1499_v0 = vsel %vm1479_vm11, %v1466_v47, %v3148_v62  ;;  %v1351_v3 = vsel %vm1347_vm7, %v1304_v9, %v3011_v8  ;;  %v410_v62 = vsel %vm2606_vm5, %v405_v41, %v3206_v27  ;;  %v420_v48 = vsel %vm2606_vm5, %v415_v31, %v419_v55  ;;  %v205_v31 = vld [vmem:[%s2540_s17 + $0xc4] sm:$0xf] }
  0xc8   : > { %v1283_v5 = vpop.permute.xlu1 %1282  ;;  %v1532_v10 = vsel %vm1512_vm12, %v1499_v0, %v1250_v32  ;;  %v1384_v32 = vsel %vm1380_vm8, %v1351_v3, %v3064_v52  ;;  %v2114_v37 = vrot.slane %v676_v26, 9  ;;  %v846_v27 = vrot.slane %v3177_v34, 5  ;;  %v668_v34 = vld [vmem:[%s2540_s17 + $0x54] sm:$0xe]  ;;  %v224_v3 = vld [vmem:[%s2540_s17 + $0xc8] sm:$0x1] }
  0xc9   : > { %v1563_v12 = vsel %vm1545_vm13, %v1530_v63, %v1283_v5  ;;  %v1234_v43 = vpop.permute.xlu0 %1233  ;;  %v1417_v8 = vsel %vm1413_vm9, %v1384_v32, %v3088_v49  ;;  %v845_v63 = vrot.slane %v843_v45, 4  ;;  %v3299_v52 = vcombine.low %v410_v62, %v420_v48 }
  0xca   : > { %1222 = vrot.lane.b32.xlu1 %v3204_v35, %s2503_s4  ;;  %2414 = vmatprep.mubr.msk.bf16.mxu1 %vm1578_vm14, %v1563_v12  ;;  %v1450_v5 = vsel %vm1446_vm10, %v1417_v8, %v3132_v25  ;;  %v787_v16 = vrot.slane %v3164_v22, 5  ;;  %v844_v6 = vsel %vm2572_vm4, %v2114_v37, %v843_v45  ;;  %v790_v33 = vrot.slane %v3213_v7, 5 }
  0xcb   : > { %1204 = vrot.lane.b32.xlu0 %v3100_v58, %s2503_s4  ;;  %v1483_v12 = vsel %vm1479_vm11, %v1450_v5, %v3183_v18  ;;  %v847_v17 = vsel %vm2572_vm4, %v845_v63, %v846_v27  ;;  %v2106_v18 = vrot.slane %v668_v34, 9  ;;  %v614_v9 = vshrl.u32 %v204_v50, 16 }
  0xcc   : > { %v3252_v11 = vpop.permute.xlu1 %994  ;;  %v1516_v49 = vsel %vm1512_vm12, %v1483_v12, %v1234_v43  ;;  %v789_v43 = vrot.slane %v787_v16, 4  ;;  %v3325_v51 = vcombine.low %v844_v6, %v847_v17  ;;  %v617_v47 = vshll.u32 %v204_v50, 16 }
  0xcd   : > { %v1267_v14 = vpop.permute.xlu0 %1266  ;;  %v788_v60 = vsel %vm2572_vm4, %v2106_v18, %v787_v16  ;;  %v633_v32 = vshll.u32 %v224_v3, 16  ;;  %v2165_v37 = vcombine.low %v204_v50, %v205_v31  ;;  %v3400_v50 = vld [vmem:[%s2540_s17 + $0xd0] sm:$0xf] }
  0xce   : > { %1255 = vrot.lane.b32.xlu1 %v3109_v29, %s2504_s9  ;;  %v1547_v57 = vsel %vm1545_vm13, %v1514_v23, %v1267_v14  ;;  %v791_v41 = vsel %vm2572_vm4, %v789_v43, %v790_v33  ;;  %v627_v23 = vshrl.u32 %v205_v31, 16  ;;  %v623_v14 = vshll.u32 %v205_v31, 16 }
  0xcf   : > { %1206 = vrot.lane.b32.xlu0 %v3250_v15, %s2503_s4  ;;  %2398 = vmatprep.mubr.msk.bf16.mxu0 %vm1578_vm14, %v1547_v57  ;;  %v616_v57 = vrot.slane %v614_v9, 4  ;;  %v619_v45 = vrot.slane %v617_v47, 5  ;;  %v635_v5 = vrot.slane %v633_v32, 5  ;;  %v853_v33 = vrot.slane %v224_v3, 5 }
  0xd0   : > { %v1285_v13 = vpop.permute.xlu1 %1284 }
  0xd1   : > { %v1565_v53 = vsel %vm1545_vm13, %v1532_v10, %v1285_v13  ;;  %v3287_v61 = vpop.permute.xlu0 %978  ;;  %v625_v10 = vrot.slane %v623_v14, 5  ;;  %v629_v13 = vrot.slane %v627_v23, 4  ;;  %v620_v62 = vor.u32 %v619_v45, %v616_v57 }
  0xd2   : > { %1257 = vrot.lane.b32.xlu1 %v3266_v59, %s2504_s9  ;;  %2415 = vmatmul.mubr.msk.bf16.vlgmr.msra.gmra.mrb[0].mxu1 %vm1578_vm14, %v1565_v53  ;;  %v651_v14 = vshrl.u32 %v3400_v50, 16  ;;  %v647_v57 = vshll.u32 %v3400_v50, 16 }
  0xd3   : > { %1239 = vrot.lane.b32.xlu0 %v3146_v38, %s2504_s9  ;;  %v630_v48 = vor.u32 %v629_v13, %v625_v10  ;;  %v621_v63 = vrot.slane %v620_v62, 4 }
  0xd4   : > { %v3301_v19 = vpop.permute.xlu1 %996  ;;  %v653_v32 = vrot.slane %v651_v14, 4 }
  0xd5   : > { %v1269_v56 = vpop.permute.xlu0 %1268  ;;  %v631_v27 = vrot.slane %v630_v48, 4  ;;  %v649_v48 = vrot.slane %v647_v57, 5 }
  0xd6   : > { %1290 = vrot.lane.b32.xlu1 %v3161_v1, %s2505_s16  ;;  %v1549_v25 = vsel %vm1545_vm13, %v1516_v49, %v1269_v56  ;;  %v850_v56 = vrot.slane %v205_v31, 5 }
  0xd7   : > { %1241 = vrot.lane.b32.xlu0 %v3299_v52, %s2504_s9  ;;  %2399 = vmatmul.mubr.msk.bf16.vlgmr.msra.gmra.mrb[0].mxu0 %vm1578_vm14, %v1549_v25  ;;  %v636_v49 = vsel %vm2606_vm5, %v631_v27, %v635_v5  ;;  %v677_v25 = vld [vmem:[%s2540_s17 + $0xc0] sm:$0xe]  ;;  %v3421_v27 = vld [vmem:[%s2540_s17 + $0xd4] sm:$0x1] }
  0xd8   : > { %v3318_v22 = vpop.permute.xlu1 %1074  ;;  %v2115_v18 = vrot.slane %v677_v25, 9  ;;  %v852_v43 = vrot.slane %v850_v56, 4 }
  0xd9   : > { %v3321_v44 = vpop.permute.xlu0 %980 }
  0xda   : > { %1002 = vrot.lane.b32.xlu1 %v3109_v29, %s2500_s20  ;;  %v3341_v29 = vcombine.low %v788_v60, %v791_v41  ;;  %v206_v60 = vld [vmem:[%s2540_s17 + $0xcc] sm:$0xf]  ;;  %v854_v23 = vsel %vm2572_vm4, %v852_v43, %v853_v33 }
  0xdb   : > { %1274 = vrot.lane.b32.xlu0 %v3187_v20, %s2505_s16  ;;  %v638_v9 = vshrl.u32 %v206_v60, 16  ;;  %v641_v47 = vshll.u32 %v206_v60, 16 }
  0xdc   : > { %v3329_v39 = vpop.permute.xlu1 %1076 }
  0xdd   : > { %v3335_v30 = vpop.permute.xlu0 %1058  ;;  %v640_v3 = vrot.slane %v638_v9, 4  ;;  %v643_v62 = vrot.slane %v641_v47, 5 }
  0xde   : > { %1292 = vrot.lane.b32.xlu1 %v3325_v51, %s2505_s16 }
  0xdf   : > { %986 = vrot.lane.b32.xlu0 %v3146_v38, %s2500_s20 }
  0xe0   : > { %v3343_v7 = vpop.permute.xlu1 %1110 }
  0xe1   : > { %v3347_v55 = vpop.permute.xlu0 %1060 }
  0xe2   : > { %1004 = vrot.lane.b32.xlu1 %v3266_v59, %s2500_s20 }
  0xe3   : > { %1276 = vrot.lane.b32.xlu0 %v3341_v29, %s2505_s16 }
  0xe4   : > { %v3353_v38 = vpop.permute.xlu1 %1112 }
  0xe5   : > { %v3355_v0 = vpop.permute.xlu0 %1094 }
  0xe6   : > { %1082 = vrot.lane.b32.xlu1 %v3161_v1, %s2499_s19 }
  0xe7   : > { %988 = vrot.lane.b32.xlu0 %v3299_v52, %s2500_s20 }
  0xe8   : > { %v3361_v26 = vpop.permute.xlu1 %1145 }
  0xe9   : > { %v3364_v53 = vpop.permute.xlu0 %1096 }
  0xea   : > { %1084 = vrot.lane.b32.xlu1 %v3325_v51, %s2499_s19 }
  0xeb   : > { %1066 = vrot.lane.b32.xlu0 %v3187_v20, %s2499_s19  ;;  %v626_v20 = vsel %vm2606_vm5, %v621_v63, %v625_v10 }
  0xec   : > { %v3370_v1 = vpop.permute.xlu1 %1147  ;;  %v3394_v17 = vcombine.low %v626_v20, %v636_v49  ;;  %v654_v49 = vor.u32 %v653_v32, %v649_v48 }
  0xed   : > { %v3372_v8 = vpop.permute.xlu0 %1129 }
  0xee   : > { %1118 = vrot.lane.b32.xlu1 %v3204_v35, %s2498_s18  ;;  %v655_v47 = vrot.slane %v654_v49, 4 }
  0xef   : > { %1068 = vrot.lane.b32.xlu0 %v3341_v29, %s2499_s19  ;;  %s2230_s19 = sshll.u32 %s3700_s13, 7 }
  0xf0   : > { %v1181_v12 = vpop.permute.xlu1 %1180  ;;  %s3620_s22 = scalar_lea.vmem %s3672_s3, %s2230_s19 }
  0xf1   : > { %v3378_v16 = vpop.permute.xlu0 %1131 }
  0xf2   : > { %1120 = vrot.lane.b32.xlu1 %v2165_v37, %s2498_s18 }
  0xf3   : > { %1102 = vrot.lane.b32.xlu0 %v3250_v15, %s2498_s18 }
  0xf4   : > { %v3387_v34 = vpop.permute.xlu1 %1182 }
  0xf5   : > { %v3390_v6 = vpop.permute.xlu0 %1164 }
  0xf6   : > { %1153 = vrot.lane.b32.xlu1 %v3266_v59, %s2501_s21  ;;  %v851_v59 = vsel %vm2572_vm4, %v2115_v18, %v850_v56  ;;  %v657_v56 = vshll.u32 %v3421_v27, 16 }
  0xf7   : > { %1104 = vrot.lane.b32.xlu0 %v3130_v46, %s2498_s18  ;;  %v3416_v13 = vcombine.low %v851_v59, %v854_v23 }
  0xf8   : > { %v1217_v41 = vpop.permute.xlu1 %1216  ;;  %v659_v59 = vrot.slane %v657_v56, 5 }
  0xf9   : > { %v3402_v31 = vpop.permute.xlu0 %1166 }
  0xfa   : > { %1155 = vrot.lane.b32.xlu1 %v3394_v17, %s2501_s21 }
  0xfb   : > { %1137 = vrot.lane.b32.xlu0 %v3299_v52, %s2501_s21  ;;  %v1331_v52 = vsel %vm1298_vm6, %v2672_v2, %v3252_v11 }
  0xfc   : > { %v1219_v45 = vpop.permute.xlu1 %1218  ;;  %v1369_v20 = vsel %vm1347_vm7, %v1331_v52, %v3318_v22  ;;  %v2168_v22 = vcombine.low %v206_v60, %v3400_v50  ;;  %v1334_v60 = vsel %vm1298_vm6, %v2778_v42, %v3301_v19  ;;  %v660_v42 = vsel %vm2606_vm5, %v655_v47, %v659_v59  ;;  %v678_v19 = vld [vmem:[%s2540_s17 + $0xcc] sm:$0xe] }
  0xfd   : > { %v1201_v10 = vpop.permute.xlu0 %1200  ;;  %v1402_v25 = vsel %vm1380_vm8, %v1369_v20, %v3343_v7 }
  0xfe   : > { %1188 = vrot.lane.b32.xlu1 %v3325_v51, %s2502_s26  ;;  %v644_v51 = vor.u32 %v643_v62, %v640_v3  ;;  %v1435_v2 = vsel %vm1413_vm9, %v1402_v25, %v3361_v26 }
  0xff   : > { %1139 = vrot.lane.b32.xlu0 %v2687_v28, %s2501_s21  ;;  %v1468_v11 = vsel %vm1446_vm10, %v1435_v2, %v1181_v12 }
 0x100   : > { %v1252_v63 = vpop.permute.xlu1 %1251  ;;  %v645_v33 = vrot.slane %v644_v51, 4  ;;  %v1501_v9 = vsel %vm1479_vm11, %v1468_v11, %v1217_v41  ;;  %v3694_v11 = vld [vmem:[#allocation2_spill] sm:$0xff] }
 0x101   : > { %v3426_v5 = vpop.permute.xlu0 %1202  ;;  %v1534_v7 = vsel %vm1512_vm12, %v1501_v9, %v1252_v63 }
 0x102   : > { %1190 = vrot.lane.b32.xlu1 %v3416_v13, %s2502_s26 }
 0x103   : > { %1172 = vrot.lane.b32.xlu0 %v3341_v29, %s2502_s26  ;;  %v1307_v29 = vsel %vm1298_vm6, %v2696_v36, %v3287_v61  ;;  %v650_v36 = vsel %vm2606_vm5, %v645_v33, %v649_v48  ;;  %v1371_v61 = vsel %vm1347_vm7, %v1334_v60, %v3329_v39 }
 0x104   : > { %v1254_v18 = vpop.permute.xlu1 %1253  ;;  %v1404_v14 = vsel %vm1380_vm8, %v1371_v61, %v3353_v38  ;;  %v2169_v38 = vcombine.low %v650_v36, %v660_v42  ;;  %v3695_v61 = vld [vmem:[#allocation5_spill] sm:$0xff] }
 0x105   : > { %v1236_v43 = vpop.permute.xlu0 %1235  ;;  %v1437_v39 = vsel %vm1413_vm9, %v1404_v14, %v3370_v1  ;;  %v860_v1 = vrot.slane %v3421_v27, 5 }
 0x106   : > { %1224 = vrot.lane.b32.xlu1 %v2165_v37, %s2503_s4  ;;  %v1353_v37 = vsel %vm1347_vm7, %v1307_v29, %v3335_v30 }
 0x107   : > { %1174 = vrot.lane.b32.xlu0 %v2592_v40, %s2502_s26  ;;  %v1386_v41 = vsel %vm1380_vm8, %v1353_v37, %v3355_v0  ;;  %v857_v0 = vrot.slane %v3400_v50, 5 }
 0x108   : > { %v1287_v26 = vpop.permute.xlu1 %1286  ;;  %v1419_v30 = vsel %vm1413_vm9, %v1386_v41, %v3372_v8  ;;  %v1470_v8 = vsel %vm1446_vm10, %v1437_v39, %v3387_v34 }
 0x109   : > { %v1567_v12 = vsel %vm1545_vm13, %v1534_v7, %v1287_v26  ;;  %v1238_v23 = vpop.permute.xlu0 %1237  ;;  %v1452_v57 = vsel %vm1446_vm10, %v1419_v30, %v3390_v6  ;;  %v2116_v6 = vrot.slane %v678_v19, 9  ;;  %v859_v32 = vrot.slane %v857_v0, 4 }
 0x10a   : > { %1226 = vrot.lane.b32.xlu1 %v2168_v22, %s2503_s4  ;;  %2418 = vmatprep.mubr.msk.bf16.mxu1 %vm1578_vm14, %v1567_v12  ;;  %v1485_v54 = vsel %vm1479_vm11, %v1452_v57, %v1201_v10  ;;  %v3692_v10 = vld [vmem:[#allocation4_spill] sm:$0xff] }
 0x10b   : > { %1208 = vrot.lane.b32.xlu0 %v3130_v46, %s2503_s4  ;;  %v1518_v50 = vsel %vm1512_vm12, %v1485_v54, %v1236_v43  ;;  %v1503_v46 = vsel %vm1479_vm11, %v1470_v8, %v1219_v45  ;;  %v1310_v63 = vsel %vm1298_vm6, %v3692_v10, %v3321_v44  ;;  %v861_v20 = vsel %vm2572_vm4, %v859_v32, %v860_v1 }
 0x10c   : > { %v3475_v3 = vpop.permute.xlu1 %998  ;;  %v1536_v34 = vsel %vm1512_vm12, %v1503_v46, %v1254_v18  ;;  %v1355_v45 = vsel %vm1347_vm7, %v1310_v63, %v3347_v55  ;;  %v3693_v18 = vld [vmem:[#allocation3_spill] sm:$0xff] }
 0x10d   : > { %v1271_v62 = vpop.permute.xlu0 %1270  ;;  %v1388_v27 = vsel %vm1380_vm8, %v1355_v45, %v3364_v53  ;;  %v1337_v30 = vsel %vm1298_vm6, %v3695_v61, %v3475_v3 }
 0x10e   : > { %1259 = vrot.lane.b32.xlu1 %v3394_v17, %s2504_s9  ;;  %v1551_v48 = vsel %vm1545_vm13, %v1518_v50, %v1271_v62  ;;  %v1421_v44 = vsel %vm1413_vm9, %v1388_v27, %v3378_v16  ;;  %v3696_v50 = vld [vmem:[#allocation6_spill] sm:$0xff] }
 0x10f   : > { %1210 = vrot.lane.b32.xlu0 %v2549_v4, %s2503_s4  ;;  %2402 = vmatprep.mubr.msk.bf16.mxu0 %vm1578_vm14, %v1551_v48  ;;  %v858_v4 = vsel %vm2572_vm4, %v2116_v6, %v857_v0  ;;  %v1454_v55 = vsel %vm1446_vm10, %v1421_v44, %v3402_v31  ;;  %v3697_v48 = vld [vmem:[#allocation7_spill] sm:$0xff] }
 0x110   : > { %v1289_v17 = vpop.permute.xlu1 %1288  ;;  %v1487_v49 = vsel %vm1479_vm11, %v1454_v55, %v3426_v5  ;;  %v2170_v16 = vcombine.low %v858_v4, %v861_v20 }
 0x111   : > { %v1569_v52 = vsel %vm1545_vm13, %v1536_v34, %v1289_v17  ;;  %v983_v51 = vpop.permute.xlu0 %982  ;;  %v1520_v56 = vsel %vm1512_vm12, %v1487_v49, %v1238_v23  ;;  %v3698_v49 = vld [vmem:[#allocation8_spill] sm:$0xff] }
 0x112   : > { %1261 = vrot.lane.b32.xlu1 %v2169_v38, %s2504_s9  ;;  %2419 = vmatmul.mubr.msk.bf16.gmra.mrb[4].mxu1 %vm1578_vm14, %v1569_v52  ;;  %v1313_v62 = vsel %vm1298_vm6, %v3696_v50, %v983_v51 }
 0x113   : > { %1243 = vrot.lane.b32.xlu0 %v2687_v28, %s2504_s9 }
 0x114   : > { %v1001_v53 = vpop.permute.xlu1 %1000 }
 0x115   : > { %v1273_v25 = vpop.permute.xlu0 %1272  ;;  %v1340_v32 = vsel %vm1298_vm6, %v3697_v48, %v1001_v53 }
 0x116   : > { %1294 = vrot.lane.b32.xlu1 %v3416_v13, %s2505_s16  ;;  %v1553_v21 = vsel %vm1545_vm13, %v1520_v56, %v1273_v25 }
 0x117   : > { %1245 = vrot.lane.b32.xlu0 %v3693_v18, %s2504_s9  ;;  %2403 = vmatmul.mubr.msk.bf16.gmra.mrb[4].mxu0 %vm1578_vm14, %v1553_v21 }
 0x118   : > { %v1079_v31 = vpop.permute.xlu1 %1078 }
 0x119   : > { %v985_v28 = vpop.permute.xlu0 %984  ;;  %v1373_v19 = vsel %vm1347_vm7, %v1337_v30, %v1079_v31 }
 0x11a   : > { %1296 = vrot.lane.b32.xlu1 %v2170_v16, %s2505_s16  ;;  %v1316_v56 = vsel %vm1298_vm6, %v3698_v49, %v985_v28 }
 0x11b   : > { %1278 = vrot.lane.b32.xlu0 %v2592_v40, %s2505_s16 }
 0x11c   : > { %v1081_v5 = vpop.permute.xlu1 %1080 }
 0x11d   : > { %v1063_v2 = vpop.permute.xlu0 %1062  ;;  %v1375_v63 = vsel %vm1347_vm7, %v1340_v32, %v1081_v5 }
 0x11e   : > { %v1357_v3 = vsel %vm1347_vm7, %v1313_v62, %v1063_v2 }
 0x11f   : > { %1280 = vrot.lane.b32.xlu0 %v3694_v11, %s2505_s16 }
 0x120   : > { %v1115_v13 = vpop.permute.xlu1 %1114 }
 0x121   : > { %v1065_v43 = vpop.permute.xlu0 %1064  ;;  %v1406_v0 = vsel %vm1380_vm8, %v1373_v19, %v1115_v13 }
 0x122   : > { %v1359_v21 = vsel %vm1347_vm7, %v1316_v56, %v1065_v43 }
 0x124   : > { %v1117_v22 = vpop.permute.xlu1 %1116 }
 0x125   : > { %v1099_v33 = vpop.permute.xlu0 %1098  ;;  %v1408_v17 = vsel %vm1380_vm8, %v1375_v63, %v1117_v22 }
 0x126   : > { %v1390_v1 = vsel %vm1380_vm8, %v1357_v3, %v1099_v33 }
 0x128   : > { %v1150_v9 = vpop.permute.xlu1 %1149 }
 0x129   : > { %v1101_v47 = vpop.permute.xlu0 %1100  ;;  %v1439_v57 = vsel %vm1413_vm9, %v1406_v0, %v1150_v9 }
 0x12a   : > { %v1392_v31 = vsel %vm1380_vm8, %v1359_v21, %v1101_v47 }
 0x12c   : > { %v1152_v59 = vpop.permute.xlu1 %1151 }
 0x12d   : > { %v1134_v29 = vpop.permute.xlu0 %1133  ;;  %v1441_v27 = vsel %vm1413_vm9, %v1408_v17, %v1152_v59 }
 0x12e   : > { %v1423_v34 = vsel %vm1413_vm9, %v1390_v1, %v1134_v29 }
 0x130   : > { %v1185_v7 = vpop.permute.xlu1 %1184 }
 0x131   : > { %v1136_v26 = vpop.permute.xlu0 %1135  ;;  %v1472_v39 = vsel %vm1446_vm10, %v1439_v57, %v1185_v7 }
 0x132   : > { %v1425_v2 = vsel %vm1413_vm9, %v1392_v31, %v1136_v26 }
 0x134   : > { %v1187_v37 = vpop.permute.xlu1 %1186 }
 0x135   : > { %v1169_v12 = vpop.permute.xlu0 %1168  ;;  %v1474_v44 = vsel %vm1446_vm10, %v1441_v27, %v1187_v37 }
 0x136   : > { %v1456_v45 = vsel %vm1446_vm10, %v1423_v34, %v1169_v12 }
 0x138   : > { %v1221_v60 = vpop.permute.xlu1 %1220 }
 0x139   : > { %v1171_v41 = vpop.permute.xlu0 %1170  ;;  %v1505_v8 = vsel %vm1479_vm11, %v1472_v39, %v1221_v60 }
 0x13a   : > { %v1458_v11 = vsel %vm1446_vm10, %v1425_v2, %v1171_v41 }
 0x13c   : > { %v1223_v40 = vpop.permute.xlu1 %1222 }
 0x13d   : > { %v1205_v23 = vpop.permute.xlu0 %1204  ;;  %v1507_v55 = vsel %vm1479_vm11, %v1474_v44, %v1223_v40 }
 0x13e   : > { %v1489_v51 = vsel %vm1479_vm11, %v1456_v45, %v1205_v23 }
 0x140   : > { %v1256_v36 = vpop.permute.xlu1 %1255 }
 0x141   : > { %v1207_v42 = vpop.permute.xlu0 %1206  ;;  %v1538_v38 = vsel %vm1512_vm12, %v1505_v8, %v1256_v36 }
 0x142   : > { %v1491_v28 = vsel %vm1479_vm11, %v1458_v11, %v1207_v42 }
 0x144   : > { %v1258_v14 = vpop.permute.xlu1 %1257 }
 0x145   : > { %v1240_v54 = vpop.permute.xlu0 %1239  ;;  %v1540_v25 = vsel %vm1512_vm12, %v1507_v55, %v1258_v14 }
 0x146   : > { %v1522_v4 = vsel %vm1512_vm12, %v1489_v51, %v1240_v54 }
 0x148   : > { %v1291_v6 = vpop.permute.xlu1 %1290 }
 0x149   : > { %v1571_v46 = vsel %vm1545_vm13, %v1538_v38, %v1291_v6  ;;  %v1242_v10 = vpop.permute.xlu0 %1241 }
 0x14a   : > { %2422 = vmatprep.mubr.msk.bf16.mxu1 %vm1578_vm14, %v1571_v46  ;;  %v1524_v22 = vsel %vm1512_vm12, %v1491_v28, %v1242_v10 }
 0x14c   : > { %v1003_v52 = vpop.permute.xlu1 %1002 }
 0x14d   : > { %v1275_v20 = vpop.permute.xlu0 %1274  ;;  %v1343_v54 = vsel %vm1298_vm6, %v3078_v24, %v1003_v52 }
 0x14e   : > { %v1555_v53 = vsel %vm1545_vm13, %v1522_v4, %v1275_v20 }
 0x14f   : > { %2406 = vmatprep.mubr.msk.bf16.mxu0 %vm1578_vm14, %v1555_v53 }
 0x150   : > { %v1293_v16 = vpop.permute.xlu1 %1292 }
 0x151   : > { %v1573_v18 = vsel %vm1545_vm13, %v1540_v25, %v1293_v16  ;;  %v987_v5 = vpop.permute.xlu0 %986 }
 0x152   : > { %2423 = vmatmul.mubr.msk.bf16.gmra.mrb[8].mxu1 %vm1578_vm14, %v1573_v18  ;;  %v1319_v24 = vsel %vm1298_vm6, %v3100_v58, %v987_v5 }
 0x154   : > { %v1005_v13 = vpop.permute.xlu1 %1004 }
 0x155   : > { %v1277_v33 = vpop.permute.xlu0 %1276  ;;  %v1346_v3 = vsel %vm1298_vm6, %v3204_v35, %v1005_v13 }
 0x156   : > { %v1557_v9 = vsel %vm1545_vm13, %v1524_v22, %v1277_v33  ;;  %v3610_v22 = vld [vmem:[%s3671_s2] ss:$0 sm:$0xff] }
 0x157   : > { %2407 = vmatmul.mubr.msk.bf16.gmra.mrb[8].mxu0 %vm1578_vm14, %v1557_v9 }
 0x158   : > { %v1083_v43 = vpop.permute.xlu1 %1082 }
 0x159   : > { %v989_v59 = vpop.permute.xlu0 %988  ;;  %v1377_v50 = vsel %vm1347_vm7, %v1343_v54, %v1083_v43 }
 0x15a   : > { %v1322_v4 = vsel %vm1298_vm6, %v3250_v15, %v989_v59 }
 0x15c   : > { %v1085_v47 = vpop.permute.xlu1 %1084 }
 0x15d   : > { %v1067_v29 = vpop.permute.xlu0 %1066  ;;  %v1379_v32 = vsel %vm1347_vm7, %v1346_v3, %v1085_v47 }
 0x15e   : > { %v1361_v17 = vsel %vm1347_vm7, %v1319_v24, %v1067_v29 }
 0x160   : > { %v1119_v7 = vpop.permute.xlu1 %1118 }
 0x161   : > { %v1069_v37 = vpop.permute.xlu0 %1068  ;;  %v1410_v62 = vsel %vm1380_vm8, %v1377_v50, %v1119_v7 }
 0x162   : > { %v1363_v49 = vsel %vm1347_vm7, %v1322_v4, %v1069_v37 }
 0x164   : > { %v1121_v12 = vpop.permute.xlu1 %1120 }
 0x165   : > { %v1103_v26 = vpop.permute.xlu0 %1102  ;;  %v1412_v10 = vsel %vm1380_vm8, %v1379_v32, %v1121_v12 }
 0x166   : > { %v1394_v52 = vsel %vm1380_vm8, %v1361_v17, %v1103_v26 }
 0x168   : > { %v1154_v60 = vpop.permute.xlu1 %1153 }
 0x169   : > { %v1105_v41 = vpop.permute.xlu0 %1104  ;;  %v1443_v6 = vsel %vm1413_vm9, %v1410_v62, %v1154_v60 }
 0x16a   : > { %v1396_v16 = vsel %vm1380_vm8, %v1363_v49, %v1105_v41 }
 0x16c   : > { %v1156_v40 = vpop.permute.xlu1 %1155 }
 0x16d   : > { %v1138_v23 = vpop.permute.xlu0 %1137  ;;  %v1445_v45 = vsel %vm1413_vm9, %v1412_v10, %v1156_v40 }
 0x16e   : > { %v1427_v58 = vsel %vm1413_vm9, %v1394_v52, %v1138_v23 }
 0x170   : > { %v1189_v36 = vpop.permute.xlu1 %1188 }
 0x171   : > { %v1140_v61 = vpop.permute.xlu0 %1139  ;;  %v1476_v46 = vsel %vm1446_vm10, %v1443_v6, %v1189_v36 }
 0x172   : > { %v1429_v15 = vsel %vm1413_vm9, %v1396_v16, %v1140_v61 }
 0x174   : > { %v1191_v30 = vpop.permute.xlu1 %1190 }
 0x175   : > { %v1173_v42 = vpop.permute.xlu0 %1172  ;;  %v1478_v27 = vsel %vm1446_vm10, %v1445_v45, %v1191_v30 }
 0x176   : > { %v1460_v20 = vsel %vm1446_vm10, %v1427_v58, %v1173_v42 }
 0x178   : > { %v1225_v19 = vpop.permute.xlu1 %1224 }
 0x179   : > { %v1175_v0 = vpop.permute.xlu0 %1174  ;;  %v1509_v1 = vsel %vm1479_vm11, %v1476_v46, %v1225_v19 }
 0x17a   : > { %v1462_v5 = vsel %vm1446_vm10, %v1429_v15, %v1175_v0 }
 0x17c   : > { %v1227_v14 = vpop.permute.xlu1 %1226 }
 0x17d   : > { %v1209_v57 = vpop.permute.xlu0 %1208  ;;  %v1511_v44 = vsel %vm1479_vm11, %v1478_v27, %v1227_v14 }
 0x17e   : > { %v1493_v56 = vsel %vm1479_vm11, %v1460_v20, %v1209_v57 }
 0x180   : > { %v1260_v39 = vpop.permute.xlu1 %1259 }
 0x181   : > { %v1211_v8 = vpop.permute.xlu0 %1210  ;;  %v1542_v63 = vsel %vm1512_vm12, %v1509_v1, %v1260_v39 }
 0x182   : > { %v1495_v2 = vsel %vm1479_vm11, %v1462_v5, %v1211_v8 }
 0x184   : > { %v1262_v38 = vpop.permute.xlu1 %1261 }
 0x185   : > { %v1244_v48 = vpop.permute.xlu0 %1243  ;;  %v1544_v55 = vsel %vm1512_vm12, %v1511_v44, %v1262_v38 }
 0x186   : > { %v1526_v21 = vsel %vm1512_vm12, %v1493_v56, %v1244_v48 }
 0x188   : > { %v1295_v34 = vpop.permute.xlu1 %1294 }
 0x189   : > { %v1575_v35 = vsel %vm1545_vm13, %v1542_v63, %v1295_v34  ;;  %v1246_v51 = vpop.permute.xlu0 %1245 }
 0x18a   : > { %2426 = vmatprep.mubr.msk.bf16.mxu1 %vm1578_vm14, %v1575_v35  ;;  %v1528_v11 = vsel %vm1512_vm12, %v1495_v2, %v1246_v51 }
 0x18c   : > { %v1297_v53 = vpop.permute.xlu1 %1296 }
 0x18d   : > { %v1577_v25 = vsel %vm1545_vm13, %v1544_v55, %v1297_v53  ;;  %v1279_v18 = vpop.permute.xlu0 %1278 }
 0x18e   : > { %2427 = vmatmul.mubr.msk.bf16.gmra.mrb[12].mxu1 %vm1578_vm14, %v1577_v25  ;;  %v1559_v31 = vsel %vm1545_vm13, %v1526_v21, %v1279_v18 }
 0x18f   : > { %2410 = vmatprep.mubr.msk.bf16.mxu0 %vm1578_vm14, %v1559_v31 }
 0x191   : > { %v1281_v13 = vpop.permute.xlu0 %1280 }
 0x192   : > { %v1561_v28 = vsel %vm1545_vm13, %v1528_v11, %v1281_v13 }
 0x193   : > { %2411 = vmatmul.mubr.msk.bf16.gmra.mrb[12].mxu0 %vm1578_vm14, %v1561_v28 }
 0x1a5   : > { %v2416_v33 = vpop.f32.mrb[0].mxu1 }
 0x1a6   : > { %v1790_v9 = vadd.f32 %v2416_v33, %v3610_v22  ;;  %v1781_v43 = vpop.f32.mrb[1].mxu1 }
 0x1a7   : > { %v1782_v59 = vadd.f32 %v3610_v22, %v1781_v43  ;;  %v2417_v47 = vpop.f32.mrb[2].mxu1 }
 0x1a8   : > { %v1793_v29 = vadd.f32 %v2417_v47, %v3610_v22  ;;  %v1784_v7 = vpop.f32.mrb[3].mxu1  ;;  %v1862_v12 = vmax.f32 %v1790_v9, 0.0 }
 0x1a9   : > { %v1785_v37 = vadd.f32 %v3610_v22, %v1784_v7  ;;  %v1860_v41 = vmax.f32 %v1782_v59, 0.0 }
 0x1aa   : > { %v1863_v26 = vmax.f32 %v1793_v29, 0.0  ;;  %v2400_v60 = vpop.f32.mrb[0].mxu0 }
 0x1ab   : > { %v1861_v40 = vmax.f32 %v1785_v37, 0.0  ;;  %v1726_v23 = vadd.f32 %v2400_v60, %v3610_v22  ;;  %v1717_v36 = vpop.f32.mrb[1].mxu0 }
 0x1ac   : > { %v2311_v61 = vpack.c.bf16 %v1863_v26, %v1862_v12  ;;  %v1718_v30 = vadd.f32 %v3610_v22, %v1717_v36  ;;  %v2401_v42 = vpop.f32.mrb[2].mxu0 }
 0x1ad   : > { %v2306_v19 = vpack.c.bf16 %v1861_v40, %v1860_v41  ;;  %v1729_v0 = vadd.f32 %v2401_v42, %v3610_v22  ;;  %v1720_v14 = vpop.f32.mrb[3].mxu0  ;;  %v1846_v39 = vmax.f32 %v1726_v23, 0.0 }
 0x1ae   : > { %2351 = vst [vmem:[%s3620_s22 + $0x48] sm:$0xff] %v2311_v61   ;;  %v1721_v57 = vadd.f32 %v3610_v22, %v1720_v14  ;;  %v1844_v8 = vmax.f32 %v1718_v30, 0.0 }
 0x1af   : > { %2350 = vst [vmem:[%s3620_s22 + $0x40] sm:$0xff] %v2306_v19   ;;  %v1847_v54 = vmax.f32 %v1729_v0, 0.0 }
 0x1b0   : > { %v1845_v50 = vmax.f32 %v1721_v57, 0.0 }
 0x1b1   : > { %v2271_v62 = vpack.c.bf16 %v1847_v54, %v1846_v39 }
 0x1b2   : > { %v2266_v38 = vpack.c.bf16 %v1845_v50, %v1844_v8 }
 0x1b3   : > { %2343 = vst [vmem:[%s3620_s22 + $0x8] sm:$0xff] %v2271_v62  }
 0x1b4   : > { %2267 = vst [vmem:[%s3620_s22] sm:$0xff] %v2266_v38  }
 0x1e5   : > { %v2420_v6 = vpop.f32.mrb[4].mxu1 }
 0x1e6   : > { %v1806_v3 = vadd.f32 %v2420_v6, %v3610_v22  ;;  %v1797_v46 = vpop.f32.mrb[5].mxu1 }
 0x1e7   : > { %v1798_v48 = vadd.f32 %v3610_v22, %v1797_v46  ;;  %v2421_v32 = vpop.f32.mrb[6].mxu1 }
 0x1e8   : > { %v1809_v1 = vadd.f32 %v2421_v32, %v3610_v22  ;;  %v1800_v24 = vpop.f32.mrb[7].mxu1  ;;  %v1866_v63 = vmax.f32 %v1806_v3, 0.0 }
 0x1e9   : > { %v1801_v10 = vadd.f32 %v3610_v22, %v1800_v24  ;;  %v1864_v45 = vmax.f32 %v1798_v48, 0.0 }
 0x1ea   : > { %v1867_v34 = vmax.f32 %v1809_v1, 0.0  ;;  %v2404_v17 = vpop.f32.mrb[4].mxu0 }
 0x1eb   : > { %v1865_v35 = vmax.f32 %v1801_v10, 0.0  ;;  %v1742_v52 = vadd.f32 %v2404_v17, %v3610_v22  ;;  %v1733_v27 = vpop.f32.mrb[5].mxu0 }
 0x1ec   : > { %v2321_v51 = vpack.c.bf16 %v1867_v34, %v1866_v63  ;;  %v1734_v58 = vadd.f32 %v3610_v22, %v1733_v27  ;;  %v2405_v44 = vpop.f32.mrb[6].mxu0 }
 0x1ed   : > { %v2316_v4 = vpack.c.bf16 %v1865_v35, %v1864_v45  ;;  %v1745_v20 = vadd.f32 %v2405_v44, %v3610_v22  ;;  %v1736_v55 = vpop.f32.mrb[7].mxu0  ;;  %v1850_v49 = vmax.f32 %v1742_v52, 0.0 }
 0x1ee   : > { %2353 = vst [vmem:[%s3620_s22 + $0x58] sm:$0xff] %v2321_v51   ;;  %v1737_v53 = vadd.f32 %v3610_v22, %v1736_v55  ;;  %v1848_v25 = vmax.f32 %v1734_v58, 0.0 }
 0x1ef   : > { %2352 = vst [vmem:[%s3620_s22 + $0x50] sm:$0xff] %v2316_v4   ;;  %v1851_v56 = vmax.f32 %v1745_v20, 0.0 }
 0x1f0   : > { %v1849_v16 = vmax.f32 %v1737_v53, 0.0 }
 0x1f1   : > { %v2281_v21 = vpack.c.bf16 %v1851_v56, %v1850_v49 }
 0x1f2   : > { %v2276_v18 = vpack.c.bf16 %v1849_v16, %v1848_v25 }
 0x1f3   : > { %2345 = vst [vmem:[%s3620_s22 + $0x18] sm:$0xff] %v2281_v21  }
 0x1f4   : > { %2344 = vst [vmem:[%s3620_s22 + $0x10] sm:$0xff] %v2276_v18  }
 0x225   : > { %v2424_v15 = vpop.f32.mrb[8].mxu1 }
 0x226   : > { %v1822_v31 = vadd.f32 %v2424_v15, %v3610_v22  ;;  %v1813_v5 = vpop.f32.mrb[9].mxu1 }
 0x227   : > { %v1814_v2 = vadd.f32 %v3610_v22, %v1813_v5  ;;  %v2425_v11 = vpop.f32.mrb[10].mxu1 }
 0x228   : > { %v1825_v13 = vadd.f32 %v2425_v11, %v3610_v22  ;;  %v1816_v28 = vpop.f32.mrb[11].mxu1  ;;  %v1870_v9 = vmax.f32 %v1822_v31, 0.0 }
 0x229   : > { %v1817_v33 = vadd.f32 %v3610_v22, %v1816_v28  ;;  %v1868_v47 = vmax.f32 %v1814_v2, 0.0 }
 0x22a   : > { %v1871_v43 = vmax.f32 %v1825_v13, 0.0  ;;  %v2408_v59 = vpop.f32.mrb[8].mxu0 }
 0x22b   : > { %v1869_v29 = vmax.f32 %v1817_v33, 0.0  ;;  %v1758_v7 = vadd.f32 %v2408_v59, %v3610_v22  ;;  %v1749_v37 = vpop.f32.mrb[9].mxu0 }
 0x22c   : > { %v2331_v12 = vpack.c.bf16 %v1871_v43, %v1870_v9  ;;  %v1750_v26 = vadd.f32 %v3610_v22, %v1749_v37  ;;  %v2409_v60 = vpop.f32.mrb[10].mxu0 }
 0x22d   : > { %v2326_v41 = vpack.c.bf16 %v1869_v29, %v1868_v47  ;;  %v1761_v40 = vadd.f32 %v2409_v60, %v3610_v22  ;;  %v1752_v23 = vpop.f32.mrb[11].mxu0  ;;  %v1854_v61 = vmax.f32 %v1758_v7, 0.0 }
 0x22e   : > { %2355 = vst [vmem:[%s3620_s22 + $0x68] sm:$0xff] %v2331_v12   ;;  %v1753_v36 = vadd.f32 %v3610_v22, %v1752_v23  ;;  %v1852_v42 = vmax.f32 %v1750_v26, 0.0 }
 0x22f   : > { %2354 = vst [vmem:[%s3620_s22 + $0x60] sm:$0xff] %v2326_v41   ;;  %v1855_v30 = vmax.f32 %v1761_v40, 0.0 }
 0x230   : > { %v1853_v19 = vmax.f32 %v1753_v36, 0.0 }
 0x231   : > { %v2291_v0 = vpack.c.bf16 %v1855_v30, %v1854_v61 }
 0x232   : > { %v2286_v14 = vpack.c.bf16 %v1853_v19, %v1852_v42 }
 0x233   : > { %2347 = vst [vmem:[%s3620_s22 + $0x28] sm:$0xff] %v2291_v0  }
 0x234   : > { %2346 = vst [vmem:[%s3620_s22 + $0x20] sm:$0xff] %v2286_v14  }
 0x261   : > { %v2428_v57 = vpop.f32.mrb[12].mxu1 }
 0x262   : > { %v1838_v39 = vadd.f32 %v2428_v57, %v3610_v22  ;;  %v1829_v54 = vpop.f32.mrb[13].mxu1 }
 0x263   : > { %v1830_v8 = vadd.f32 %v3610_v22, %v1829_v54  ;;  %v2429_v50 = vpop.f32.mrb[14].mxu1 }
 0x264   : > { %v1841_v62 = vadd.f32 %v2429_v50, %v3610_v22  ;;  %v1832_v38 = vpop.f32.mrb[15].mxu1  ;;  %v1874_v3 = vmax.f32 %v1838_v39, 0.0 }
 0x265   : > { %v1833_v6 = vadd.f32 %v3610_v22, %v1832_v38  ;;  %v1872_v32 = vmax.f32 %v1830_v8, 0.0 }
 0x266   : > { %v1875_v46 = vmax.f32 %v1841_v62, 0.0  ;;  %v2412_v48 = vpop.f32.mrb[12].mxu0 }
 0x267   : > { %v1873_v1 = vmax.f32 %v1833_v6, 0.0  ;;  %v1774_v24 = vadd.f32 %v2412_v48, %v3610_v22  ;;  %v1765_v10 = vpop.f32.mrb[13].mxu0 }
 0x268   : > { %v2341_v63 = vpack.c.bf16 %v1875_v46, %v1874_v3  ;;  %v1766_v34 = vadd.f32 %v3610_v22, %v1765_v10  ;;  %v2413_v17 = vpop.f32.mrb[14].mxu0 }
 0x269   : > { %v2336_v45 = vpack.c.bf16 %v1873_v1, %v1872_v32  ;;  %v1777_v35 = vadd.f32 %v2413_v17, %v3610_v22  ;;  %v1768_v52 = vpop.f32.mrb[15].mxu0  ;;  %v1858_v51 = vmax.f32 %v1774_v24, 0.0 }
 0x26a   : > { %2357 = vst [vmem:[%s3620_s22 + $0x78] sm:$0xff] %v2341_v63   ;;  %v1769_v27 = vadd.f32 %v3610_v22, %v1768_v52  ;;  %v1856_v44 = vmax.f32 %v1766_v34, 0.0 }
 0x26b   : > { %2356 = vst [vmem:[%s3620_s22 + $0x70] sm:$0xff] %v2336_v45   ;;  %v1859_v58 = vmax.f32 %v1777_v35, 0.0 }
 0x26c   : > { %v1857_v4 = vmax.f32 %v1769_v27, 0.0 }
 0x26d   : > { %v2301_v20 = vpack.c.bf16 %v1859_v58, %v1858_v51 }
 0x26e   : > { %v2296_v55 = vpack.c.bf16 %v1857_v4, %v1856_v44 }
 0x26f   : > { %2349 = vst [vmem:[%s3620_s22 + $0x38] sm:$0xff] %v2301_v20  }
 0x270   : > { %2348 = vst [vmem:[%s3620_s22 + $0x30] sm:$0xff] %v2296_v55  }
 0x271 PF: > { %s13_s12 = sadd.s32 1, %s2496_s12  }
 0x272   : > { %p10_p4 = scmp.ge.s32.totalorder %s13_s12, 4  }
 0x274   :  { %12 = sbr.rel (!%p10_p4) target bundleno = 1 (0x1), region = 62 }

</bundles_post_ra>
